<compile_context>
chip_gen: v6e
topology: v6e:2x2x1
jax: 0.10.0
libtpu: 0.0.40
codegen_flags: <defaults>
</compile_context>

<pallas_src>
import jax
import jax.numpy as jnp
from jax.experimental import pallas as pl
from jax.experimental.pallas import tpu as pltpu

# ----- synthetic "pretrained" encoder config (small, deterministic) -----
VOCAB = 50
MAX_SEQ = 8
HIDDEN = 32
HEADS = 2
HEAD_DIM = HIDDEN // HEADS
FFN = 64
LAYERS = 2
TYPE_VOCAB = 2
EPS = 1e-12

# One fused grid step over the whole (2B, S) batch: max MXU M-occupancy, minimum
# launch / grid-step overhead (v5e/v6e have a single TensorCore anyway).
# Set to 2 on v7x to shard the batch across its two TensorCores once B or S grows.
BATCH_BLOCKS = 1

_WEIGHT_KEYS = ("emb_ln_g", "emb_ln_b", "wqkv", "bqkv", "wo_h", "bo",
                "ln1_g", "ln1_b", "w1", "b1", "w2", "b2", "ln2_g", "ln2_b")


# ---------------------------------------------------------------------------
# math shared by the Pallas kernel body and the pure-JAX reference
# (weights are accessed only through indexing, so refs and arrays both work)
# ---------------------------------------------------------------------------
def _layernorm(x, g, b):
    mu = jnp.mean(x, axis=-1, keepdims=True)
    var = jnp.mean((x - mu) ** 2, axis=-1, keepdims=True)
    return (x - mu) * jax.lax.rsqrt(var + EPS) * g + b


def _gelu(x):
    c = 0.7978845608028654  # sqrt(2/pi)
    return 0.5 * x * (1.0 + jnp.tanh(c * (x + 0.044715 * x * x * x)))


def _forward_math(emb, neg, w):
    """emb: (M, H) f32 summed embeddings (M = Bb*S); neg: (Bb, 1, S) additive mask.
    w: dict of stacked per-layer weights (bf16 matmul weights, f32 biases/LN params).
    Returns (first_layer_hidden, last_hidden), both (M, H) f32."""
    M, H = emb.shape
    Bb, _, S = neg.shape

    x = _layernorm(emb, w["emb_ln_g"][...], w["emb_ln_b"][...])
    first = x
    for l in range(LAYERS):
        # ---- fused QKV projection (bf16 operands, f32 accumulation) ----
        xb = x.astype(jnp.bfloat16)
        qkv = jnp.dot(xb, w["wqkv"][l], preferred_element_type=jnp.float32) + w["bqkv"][l]
        qkv3 = qkv.reshape(Bb, S, 3 * H)          # sublane-tile-aligned split (S == 8)

        # ---- multi-head attention: batched over sequences, static loop over heads,
        #      per-head output-projection blocks instead of concatenating contexts ----
        attn = jnp.zeros((M, H), jnp.float32)
        for h in range(HEADS):
            lo = h * HEAD_DIM
            qh = qkv3[:, :, lo:lo + HEAD_DIM].astype(jnp.bfloat16)          # scale folded in wq
            kh = qkv3[:, :, H + lo:H + lo + HEAD_DIM].astype(jnp.bfloat16)
            vh = qkv3[:, :, 2 * H + lo:2 * H + lo + HEAD_DIM].astype(jnp.bfloat16)
            sc = jnp.einsum('bqd,bkd->bqk', qh, kh,
                            preferred_element_type=jnp.float32) + neg        # (Bb,S,S)
            m = jnp.max(sc, axis=-1, keepdims=True)
            e = jnp.exp(sc - m)
            p = e / jnp.sum(e, axis=-1, keepdims=True)
            ctx = jnp.einsum('bqk,bkd->bqd', p.astype(jnp.bfloat16), vh,
                             preferred_element_type=jnp.float32)             # (Bb,S,hd)
            attn = attn + jnp.dot(ctx.reshape(M, HEAD_DIM).astype(jnp.bfloat16),
                                  w["wo_h"][l, h], preferred_element_type=jnp.float32)
        attn = attn + w["bo"][l]
        x = _layernorm(x + attn, w["ln1_g"][l], w["ln1_b"][l])

        # ---- FFN ----
        hmid = _gelu(jnp.dot(x.astype(jnp.bfloat16), w["w1"][l],
                             preferred_element_type=jnp.float32) + w["b1"][l])
        ffn = jnp.dot(hmid.astype(jnp.bfloat16), w["w2"][l],
                      preferred_element_type=jnp.float32) + w["b2"][l]
        x = _layernorm(x + ffn, w["ln2_g"][l], w["ln2_b"][l])

        if l == 0:
            first = x            # HF hidden_states[1] (layer-0 output)
    return first, x


# ---------------------------------------------------------------------------
# fused Pallas kernel: embedding LN + all transformer layers in one call
# ---------------------------------------------------------------------------
def fused_encoder_kernel(emb_ref, nmask_ref,
                         emb_g_ref, emb_b_ref, wqkv_ref, bqkv_ref, woh_ref, bo_ref,
                         ln1_g_ref, ln1_b_ref, w1_ref, b1_ref, w2_ref, b2_ref,
                         ln2_g_ref, ln2_b_ref,
                         first_ref, last_ref):
    w = {"emb_ln_g": emb_g_ref, "emb_ln_b": emb_b_ref,
         "wqkv": wqkv_ref, "bqkv": bqkv_ref, "wo_h": woh_ref, "bo": bo_ref,
         "ln1_g": ln1_g_ref, "ln1_b": ln1_b_ref,
         "w1": w1_ref, "b1": b1_ref, "w2": w2_ref, "b2": b2_ref,
         "ln2_g": ln2_g_ref, "ln2_b": ln2_b_ref}
    first, last = _forward_math(emb_ref[...].astype(jnp.float32),
                                nmask_ref[...].astype(jnp.float32), w)
    first_ref[...] = first.astype(first_ref.dtype)
    last_ref[...] = last.astype(last_ref.dtype)


def _rep_spec(arr):
    # whole-array block, same block for every grid step (weights)
    return pl.BlockSpec(arr.shape, lambda i: (0,) * arr.ndim)


def _embed_inputs(params, input_ids, attention_mask):
    """Embedding gather + sum (JAX glue) and precomputed additive attention mask."""
    B2, S = input_ids.shape
    tok = jnp.take(params["word_emb"], input_ids, axis=0)                 # (B2,S,H)
    pos = params["pos_emb"][:S][None, :, :]
    typ = params["type_emb"][0][None, None, :]                            # token_type_ids = 0
    emb = (tok + pos + typ).astype(jnp.float32).reshape(B2 * S, HIDDEN)
    neg = ((1.0 - attention_mask.astype(jnp.float32)) * (-1e9)).reshape(B2, 1, S)
    return emb, neg


def encoder_forward(params, input_ids, attention_mask):
    """Fused Pallas encoder. Returns (hidden_states[1], last_hidden_state)."""
    B2, S = input_ids.shape
    H = HIDDEN
    emb, neg = _embed_inputs(params, input_ids, attention_mask)
    weights = [params[k] for k in _WEIGHT_KEYS]

    bb = BATCH_BLOCKS
    assert B2 % bb == 0
    b_blk = B2 // bb
    m_blk = b_blk * S

    in_specs = [pl.BlockSpec((m_blk, H), lambda i: (i, 0)),
                pl.BlockSpec((b_blk, 1, S), lambda i: (i, 0, 0))]
    in_specs += [_rep_spec(wt) for wt in weights]
    out_specs = (pl.BlockSpec((m_blk, H), lambda i: (i, 0)),
                 pl.BlockSpec((m_blk, H), lambda i: (i, 0)))
    out_shape = (jax.ShapeDtypeStruct((B2 * S, H), jnp.float32),
                 jax.ShapeDtypeStruct((B2 * S, H), jnp.float32))

    first, last = pl.pallas_call(
        fused_encoder_kernel,
        grid=(bb,),
        in_specs=in_specs,
        out_specs=out_specs,
        out_shape=out_shape,
        compiler_params=pltpu.CompilerParams(dimension_semantics=("parallel",)),
    )(emb, neg, *weights)
    return first.reshape(B2, S, H), last.reshape(B2, S, H)


def encoder_forward_reference(params, input_ids, attention_mask):
    """Pure-JAX reference with identical math (for correctness checking)."""
    B2, S = input_ids.shape
    emb, neg = _embed_inputs(params, input_ids, attention_mask)
    first, last = _forward_math(emb, neg, params)
    return first.reshape(B2, S, HIDDEN), last.reshape(B2, S, HIDDEN)


# ---------------------------------------------------------------------------
# SimCSE forward (mirrors the PyTorch SimcseModel.forward glue)
# ---------------------------------------------------------------------------
def simcse_forward(params, ori_input_ids, pos_input_ids, attention_mask,
                   model_type="unsup", pooling="cls", neg_input_ids=None,
                   encoder_fn=encoder_forward):
    if model_type == "sup":
        input_ids = jnp.stack([ori_input_ids, pos_input_ids, neg_input_ids], axis=1)
        input_ids = input_ids.reshape(-1, ori_input_ids.shape[-1])
        attn = jnp.stack([attention_mask] * 3, axis=1).reshape(-1, attention_mask.shape[-1])
    else:  # 'unsup': interleave ori/pos exactly like torch.stack(dim=1).view(2B, -1)
        input_ids = jnp.stack([ori_input_ids, pos_input_ids], axis=1)
        input_ids = input_ids.reshape(-1, ori_input_ids.shape[-1])
        attn = jnp.stack([attention_mask, attention_mask], axis=1).reshape(-1, attention_mask.shape[-1])

    first, last = encoder_fn(params, input_ids, attn)

    if pooling == "cls":
        return last[:, 0]                                    # (2B, H)
    if pooling == "last-avg":
        return jnp.mean(last, axis=1)                        # avg_pool1d over seq
    if pooling == "first-last-avg":
        return (jnp.mean(first, axis=1) + jnp.mean(last, axis=1)) / 2.0
    raise ValueError(pooling)


# ---------------------------------------------------------------------------
# deterministic synthetic "pretrained" encoder weights (packed for the kernel)
# ---------------------------------------------------------------------------
def init_params(key):
    keys = iter(jax.random.split(key, 64))

    def dense(shape):
        return jax.random.normal(next(keys), shape, jnp.float32) * 0.02

    scale = 1.0 / (HEAD_DIM ** 0.5)
    wqkv, bqkv, wo_h, bo = [], [], [], []
    ln1_g, ln1_b, w1, b1, w2, b2, ln2_g, ln2_b = ([] for _ in range(8))
    for _ in range(LAYERS):
        wq = dense((HIDDEN, HIDDEN)) * scale      # fold 1/sqrt(head_dim) into the Q projection
        wk = dense((HIDDEN, HIDDEN))
        wv = dense((HIDDEN, HIDDEN))
        wo = dense((HIDDEN, HIDDEN))
        wqkv.append(jnp.concatenate([wq, wk, wv], axis=1))            # (H, 3H) fused QKV
        bqkv.append(jnp.zeros((1, 3 * HIDDEN), jnp.float32))
        wo_h.append(wo.reshape(HEADS, HEAD_DIM, HIDDEN))              # per-head output blocks
        bo.append(jnp.zeros((1, HIDDEN), jnp.float32))
        ln1_g.append(jnp.ones((1, HIDDEN), jnp.float32))
        ln1_b.append(jnp.zeros((1, HIDDEN), jnp.float32))
        w1.append(dense((HIDDEN, FFN)))
        b1.append(jnp.zeros((1, FFN), jnp.float32))
        w2.append(dense((FFN, HIDDEN)))
        b2.append(jnp.zeros((1, HIDDEN), jnp.float32))
        ln2_g.append(jnp.ones((1, HIDDEN), jnp.float32))
        ln2_b.append(jnp.zeros((1, HIDDEN), jnp.float32))

    return {
        "word_emb": dense((VOCAB, HIDDEN)),
        "pos_emb": dense((MAX_SEQ, HIDDEN)),
        "type_emb": dense((TYPE_VOCAB, HIDDEN)),
        "emb_ln_g": jnp.ones((1, HIDDEN), jnp.float32),
        "emb_ln_b": jnp.zeros((1, HIDDEN), jnp.float32),
        # bf16 MXU operands (halved VMEM traffic); biases / LN params stay f32
        "wqkv": jnp.stack(wqkv).astype(jnp.bfloat16),
        "bqkv": jnp.stack(bqkv),
        "wo_h": jnp.stack(wo_h).astype(jnp.bfloat16),
        "bo": jnp.stack(bo),
        "ln1_g": jnp.stack(ln1_g), "ln1_b": jnp.stack(ln1_b),
        "w1": jnp.stack(w1).astype(jnp.bfloat16), "b1": jnp.stack(b1),
        "w2": jnp.stack(w2).astype(jnp.bfloat16), "b2": jnp.stack(b2),
        "ln2_g": jnp.stack(ln2_g), "ln2_b": jnp.stack(ln2_b),
    }


# ---------------------------------------------------------------------------
if __name__ == "__main__":
    batch = 2
    seq = MAX_SEQ

    key = jax.random.PRNGKey(0)
    k_par, k_ori, k_pos = jax.random.split(key, 3)

    params = init_params(k_par)
    ori_ids = jax.random.randint(k_ori, (batch, seq), 0, VOCAB, dtype=jnp.int32)
    pos_ids = jax.random.randint(k_pos, (batch, seq), 0, VOCAB, dtype=jnp.int32)
    lengths = jnp.array([seq, seq - 2], dtype=jnp.int32)
    attention_mask = (jnp.arange(seq)[None, :] < lengths[:, None]).astype(jnp.int32)

    # Pallas fused-kernel path (cls pooling, like the reference training setup)
    out = simcse_forward(params, ori_ids, pos_ids, attention_mask,
                         model_type="unsup", pooling="cls")
    out = jax.block_until_ready(out)
    assert out.shape == (batch * 2, HIDDEN), out.shape
    assert bool(jnp.all(jnp.isfinite(out)))

    # exercise the second (first-layer) output too
    out_fla = simcse_forward(params, ori_ids, pos_ids, attention_mask,
                             model_type="unsup", pooling="first-last-avg")
    out_fla = jax.block_until_ready(out_fla)
    assert out_fla.shape == (batch * 2, HIDDEN), out_fla.shape
    assert bool(jnp.all(jnp.isfinite(out_fla)))

    # pure-JAX reference with identical math
    ref = simcse_forward(params, ori_ids, pos_ids, attention_mask,
                         model_type="unsup", pooling="cls",
                         encoder_fn=encoder_forward_reference)
    ref_fla = simcse_forward(params, ori_ids, pos_ids, attention_mask,
                             model_type="unsup", pooling="first-last-avg",
                             encoder_fn=encoder_forward_reference)
    assert bool(jnp.allclose(out, ref, atol=2e-2, rtol=2e-2))
    assert bool(jnp.allclose(out_fla, ref_fla, atol=2e-2, rtol=2e-2))

    print("KERNEL_OK")
</pallas_src>

<mosaic_0001>
module attributes {stable_mosaic.version = 11 : i64} {
  func.func @fused_encoder_kernel(%arg0: i32, %arg1: memref<32x32xf32, #tpu.memory_space<vmem>>, %arg2: memref<4x1x8xf32, #tpu.memory_space<vmem>>, %arg3: memref<1x32xf32, #tpu.memory_space<vmem>>, %arg4: memref<1x32xf32, #tpu.memory_space<vmem>>, %arg5: memref<2x32x96xbf16, #tpu.memory_space<vmem>>, %arg6: memref<2x1x96xf32, #tpu.memory_space<vmem>>, %arg7: memref<2x2x16x32xbf16, #tpu.memory_space<vmem>>, %arg8: memref<2x1x32xf32, #tpu.memory_space<vmem>>, %arg9: memref<2x1x32xf32, #tpu.memory_space<vmem>>, %arg10: memref<2x1x32xf32, #tpu.memory_space<vmem>>, %arg11: memref<2x32x64xbf16, #tpu.memory_space<vmem>>, %arg12: memref<2x1x64xf32, #tpu.memory_space<vmem>>, %arg13: memref<2x64x32xbf16, #tpu.memory_space<vmem>>, %arg14: memref<2x1x32xf32, #tpu.memory_space<vmem>>, %arg15: memref<2x1x32xf32, #tpu.memory_space<vmem>>, %arg16: memref<2x1x32xf32, #tpu.memory_space<vmem>>, %arg17: memref<32x32xf32, #tpu.memory_space<vmem>>, %arg18: memref<32x32xf32, #tpu.memory_space<vmem>>) attributes {dimension_semantics = [#tpu.dimension_semantics<parallel>], iteration_bounds = array<i64: 1>, scalar_prefetch = 0 : i64, scratch_operands = 0 : i64, tpu.core_type = #tpu.core_type<tc>, window_params = [{transform_indices = @transform_0, window_bounds = array<i64: 32, 32>}, {transform_indices = @transform_1, window_bounds = array<i64: 4, 1, 8>}, {pipeline_mode = #tpu.pipeline_mode<synchronous>, transform_indices = @transform_2, window_bounds = array<i64: 1, 32>}, {pipeline_mode = #tpu.pipeline_mode<synchronous>, transform_indices = @transform_3, window_bounds = array<i64: 1, 32>}, {pipeline_mode = #tpu.pipeline_mode<synchronous>, transform_indices = @transform_4, window_bounds = array<i64: 2, 32, 96>}, {pipeline_mode = #tpu.pipeline_mode<synchronous>, transform_indices = @transform_5, window_bounds = array<i64: 2, 1, 96>}, {pipeline_mode = #tpu.pipeline_mode<synchronous>, transform_indices = @transform_6, window_bounds = array<i64: 2, 2, 16, 32>}, {pipeline_mode = #tpu.pipeline_mode<synchronous>, transform_indices = @transform_7, window_bounds = array<i64: 2, 1, 32>}, {pipeline_mode = #tpu.pipeline_mode<synchronous>, transform_indices = @transform_8, window_bounds = array<i64: 2, 1, 32>}, {pipeline_mode = #tpu.pipeline_mode<synchronous>, transform_indices = @transform_9, window_bounds = array<i64: 2, 1, 32>}, {pipeline_mode = #tpu.pipeline_mode<synchronous>, transform_indices = @transform_10, window_bounds = array<i64: 2, 32, 64>}, {pipeline_mode = #tpu.pipeline_mode<synchronous>, transform_indices = @transform_11, window_bounds = array<i64: 2, 1, 64>}, {pipeline_mode = #tpu.pipeline_mode<synchronous>, transform_indices = @transform_12, window_bounds = array<i64: 2, 64, 32>}, {pipeline_mode = #tpu.pipeline_mode<synchronous>, transform_indices = @transform_13, window_bounds = array<i64: 2, 1, 32>}, {pipeline_mode = #tpu.pipeline_mode<synchronous>, transform_indices = @transform_14, window_bounds = array<i64: 2, 1, 32>}, {pipeline_mode = #tpu.pipeline_mode<synchronous>, transform_indices = @transform_15, window_bounds = array<i64: 2, 1, 32>}, {transform_indices = @transform_16, window_bounds = array<i64: 32, 32>}, {transform_indices = @transform_17, window_bounds = array<i64: 32, 32>}]} {
    %c0 = arith.constant 0 : index
    %c0_0 = arith.constant 0 : index
    %0 = vector.load %arg1[%c0, %c0_0] : memref<32x32xf32, #tpu.memory_space<vmem>>, vector<32x32xf32>
    %c0_1 = arith.constant 0 : index
    %c0_2 = arith.constant 0 : index
    %c0_3 = arith.constant 0 : index
    %1 = vector.load %arg2[%c0_1, %c0_2, %c0_3] : memref<4x1x8xf32, #tpu.memory_space<vmem>>, vector<4x1x8xf32>
    %c0_4 = arith.constant 0 : index
    %c0_5 = arith.constant 0 : index
    %2 = vector.load %arg3[%c0_4, %c0_5] : memref<1x32xf32, #tpu.memory_space<vmem>>, vector<1x32xf32>
    %c0_6 = arith.constant 0 : index
    %c0_7 = arith.constant 0 : index
    %3 = vector.load %arg4[%c0_6, %c0_7] : memref<1x32xf32, #tpu.memory_space<vmem>>, vector<1x32xf32>
    %cst = arith.constant dense<0.000000e+00> : vector<32xf32>
    %4 = vector.multi_reduction <add>, %0, %cst [1] : vector<32x32xf32> to vector<32xf32>
    %5 = vector.shape_cast %4 : vector<32xf32> to vector<32x1xf32>
    %cst_8 = arith.constant 3.200000e+01 : f32
    %6 = vector.broadcast %cst_8 : f32 to vector<32x1xf32>
    %7 = arith.divf %5, %6 : vector<32x1xf32>
    %8 = vector.broadcast %7 : vector<32x1xf32> to vector<32x32xf32>
    %9 = arith.subf %0, %8 : vector<32x32xf32>
    %10 = arith.mulf %9, %9 : vector<32x32xf32>
    %cst_9 = arith.constant dense<0.000000e+00> : vector<32xf32>
    %11 = vector.multi_reduction <add>, %10, %cst_9 [1] : vector<32x32xf32> to vector<32xf32>
    %12 = vector.shape_cast %11 : vector<32xf32> to vector<32x1xf32>
    %cst_10 = arith.constant 3.200000e+01 : f32
    %13 = vector.broadcast %cst_10 : f32 to vector<32x1xf32>
    %14 = arith.divf %12, %13 : vector<32x1xf32>
    %15 = vector.broadcast %7 : vector<32x1xf32> to vector<32x32xf32>
    %16 = arith.subf %0, %15 : vector<32x32xf32>
    %cst_11 = arith.constant 9.99999996E-13 : f32
    %17 = vector.broadcast %cst_11 : f32 to vector<32x1xf32>
    %18 = arith.addf %14, %17 : vector<32x1xf32>
    %19 = math.rsqrt %18 : vector<32x1xf32>
    %20 = vector.broadcast %19 : vector<32x1xf32> to vector<32x32xf32>
    %21 = arith.mulf %16, %20 : vector<32x32xf32>
    %22 = vector.broadcast %2 : vector<1x32xf32> to vector<32x32xf32>
    %23 = arith.mulf %21, %22 : vector<32x32xf32>
    %24 = vector.broadcast %3 : vector<1x32xf32> to vector<32x32xf32>
    %25 = arith.addf %23, %24 : vector<32x32xf32>
    %26 = arith.truncf %25 : vector<32x32xf32> to vector<32x32xbf16>
    %c0_12 = arith.constant 0 : index
    %c0_13 = arith.constant 0 : index
    %c0_14 = arith.constant 0 : index
    %27 = vector.load %arg5[%c0_12, %c0_13, %c0_14] : memref<2x32x96xbf16, #tpu.memory_space<vmem>>, vector<1x32x96xbf16>
    %28 = vector.shape_cast %27 : vector<1x32x96xbf16> to vector<32x96xbf16>
    %cst_15 = arith.constant dense<0.000000e+00> : vector<32x96xf32>
    %29 = tpu.matmul %26, %28, %cst_15 {dimension_numbers = #tpu.dot_dimension_numbers<[1], [0], [0], [1], [0, 0, 1, 1], [], []>} : vector<32x32xbf16>, vector<32x96xbf16>, vector<32x96xf32> -> vector<32x96xf32>
    %c0_16 = arith.constant 0 : index
    %c0_17 = arith.constant 0 : index
    %c0_18 = arith.constant 0 : index
    %30 = vector.load %arg6[%c0_16, %c0_17, %c0_18] : memref<2x1x96xf32, #tpu.memory_space<vmem>>, vector<1x1x96xf32>
    %31 = vector.shape_cast %30 : vector<1x1x96xf32> to vector<1x96xf32>
    %32 = vector.broadcast %31 : vector<1x96xf32> to vector<32x96xf32>
    %33 = arith.addf %29, %32 : vector<32x96xf32>
    %34 = vector.shape_cast %33 : vector<32x96xf32> to vector<4x8x96xf32>
    %cst_19 = arith.constant 0.000000e+00 : f32
    %35 = vector.broadcast %cst_19 : f32 to vector<32x32xf32>
    %36 = vector.extract_strided_slice %34 {offsets = [0, 0, 0], sizes = [4, 8, 16], strides = [1, 1, 1]} : vector<4x8x96xf32> to vector<4x8x16xf32>
    %37 = arith.truncf %36 : vector<4x8x16xf32> to vector<4x8x16xbf16>
    %38 = vector.extract_strided_slice %34 {offsets = [0, 0, 32], sizes = [4, 8, 16], strides = [1, 1, 1]} : vector<4x8x96xf32> to vector<4x8x16xf32>
    %39 = arith.truncf %38 : vector<4x8x16xf32> to vector<4x8x16xbf16>
    %40 = vector.extract_strided_slice %34 {offsets = [0, 0, 64], sizes = [4, 8, 16], strides = [1, 1, 1]} : vector<4x8x96xf32> to vector<4x8x16xf32>
    %41 = arith.truncf %40 : vector<4x8x16xf32> to vector<4x8x16xbf16>
    "tpu.trace_start"() <{level = 10 : i32, message = "bqd,bkd->bqk"}> : () -> ()
    %cst_20 = arith.constant dense<0.000000e+00> : vector<4x8x8xf32>
    %42 = tpu.matmul %37, %39, %cst_20 {dimension_numbers = #tpu.dot_dimension_numbers<[2], [2], [1], [1], [0, 0, 0, 1, 1, 1], [0], [0]>} : vector<4x8x16xbf16>, vector<4x8x16xbf16>, vector<4x8x8xf32> -> vector<4x8x8xf32>
    "tpu.trace_stop"() : () -> ()
    %43 = vector.broadcast %1 : vector<4x1x8xf32> to vector<4x8x8xf32>
    %44 = arith.addf %42, %43 : vector<4x8x8xf32>
    %cst_21 = arith.constant dense<0xFF800000> : vector<4x8xf32>
    %45 = vector.multi_reduction <maximumf>, %44, %cst_21 [2] : vector<4x8x8xf32> to vector<4x8xf32>
    %46 = vector.shape_cast %45 : vector<4x8xf32> to vector<4x8x1xf32>
    %47 = vector.broadcast %46 : vector<4x8x1xf32> to vector<4x8x8xf32>
    %48 = arith.subf %44, %47 : vector<4x8x8xf32>
    %49 = math.exp %48 : vector<4x8x8xf32>
    %cst_22 = arith.constant dense<0.000000e+00> : vector<4x8xf32>
    %50 = vector.multi_reduction <add>, %49, %cst_22 [2] : vector<4x8x8xf32> to vector<4x8xf32>
    %51 = vector.shape_cast %50 : vector<4x8xf32> to vector<4x8x1xf32>
    %52 = vector.broadcast %51 : vector<4x8x1xf32> to vector<4x8x8xf32>
    %53 = arith.divf %49, %52 : vector<4x8x8xf32>
    %54 = arith.truncf %53 : vector<4x8x8xf32> to vector<4x8x8xbf16>
    "tpu.trace_start"() <{level = 10 : i32, message = "bqk,bkd->bqd"}> : () -> ()
    %cst_23 = arith.constant dense<0.000000e+00> : vector<4x8x16xf32>
    %55 = tpu.matmul %54, %41, %cst_23 {dimension_numbers = #tpu.dot_dimension_numbers<[2], [1], [1], [2], [0, 0, 0, 1, 1, 2], [0], [0]>} : vector<4x8x8xbf16>, vector<4x8x16xbf16>, vector<4x8x16xf32> -> vector<4x8x16xf32>
    "tpu.trace_stop"() : () -> ()
    %56 = vector.shape_cast %55 : vector<4x8x16xf32> to vector<32x16xf32>
    %57 = arith.truncf %56 : vector<32x16xf32> to vector<32x16xbf16>
    %c0_24 = arith.constant 0 : index
    %c0_25 = arith.constant 0 : index
    %c0_26 = arith.constant 0 : index
    %c0_27 = arith.constant 0 : index
    %58 = vector.load %arg7[%c0_24, %c0_25, %c0_26, %c0_27] : memref<2x2x16x32xbf16, #tpu.memory_space<vmem>>, vector<1x1x16x32xbf16>
    %59 = vector.shape_cast %58 : vector<1x1x16x32xbf16> to vector<16x32xbf16>
    %cst_28 = arith.constant dense<0.000000e+00> : vector<32x32xf32>
    %60 = tpu.matmul %57, %59, %cst_28 {dimension_numbers = #tpu.dot_dimension_numbers<[1], [0], [0], [1], [0, 0, 1, 1], [], []>} : vector<32x16xbf16>, vector<16x32xbf16>, vector<32x32xf32> -> vector<32x32xf32>
    %61 = arith.addf %35, %60 : vector<32x32xf32>
    %62 = vector.extract_strided_slice %34 {offsets = [0, 0, 16], sizes = [4, 8, 16], strides = [1, 1, 1]} : vector<4x8x96xf32> to vector<4x8x16xf32>
    %63 = arith.truncf %62 : vector<4x8x16xf32> to vector<4x8x16xbf16>
    %64 = vector.extract_strided_slice %34 {offsets = [0, 0, 48], sizes = [4, 8, 16], strides = [1, 1, 1]} : vector<4x8x96xf32> to vector<4x8x16xf32>
    %65 = arith.truncf %64 : vector<4x8x16xf32> to vector<4x8x16xbf16>
    %66 = vector.extract_strided_slice %34 {offsets = [0, 0, 80], sizes = [4, 8, 16], strides = [1, 1, 1]} : vector<4x8x96xf32> to vector<4x8x16xf32>
    %67 = arith.truncf %66 : vector<4x8x16xf32> to vector<4x8x16xbf16>
    "tpu.trace_start"() <{level = 10 : i32, message = "bqd,bkd->bqk"}> : () -> ()
    %cst_29 = arith.constant dense<0.000000e+00> : vector<4x8x8xf32>
    %68 = tpu.matmul %63, %65, %cst_29 {dimension_numbers = #tpu.dot_dimension_numbers<[2], [2], [1], [1], [0, 0, 0, 1, 1, 1], [0], [0]>} : vector<4x8x16xbf16>, vector<4x8x16xbf16>, vector<4x8x8xf32> -> vector<4x8x8xf32>
    "tpu.trace_stop"() : () -> ()
    %69 = vector.broadcast %1 : vector<4x1x8xf32> to vector<4x8x8xf32>
    %70 = arith.addf %68, %69 : vector<4x8x8xf32>
    %cst_30 = arith.constant dense<0xFF800000> : vector<4x8xf32>
    %71 = vector.multi_reduction <maximumf>, %70, %cst_30 [2] : vector<4x8x8xf32> to vector<4x8xf32>
    %72 = vector.shape_cast %71 : vector<4x8xf32> to vector<4x8x1xf32>
    %73 = vector.broadcast %72 : vector<4x8x1xf32> to vector<4x8x8xf32>
    %74 = arith.subf %70, %73 : vector<4x8x8xf32>
    %75 = math.exp %74 : vector<4x8x8xf32>
    %cst_31 = arith.constant dense<0.000000e+00> : vector<4x8xf32>
    %76 = vector.multi_reduction <add>, %75, %cst_31 [2] : vector<4x8x8xf32> to vector<4x8xf32>
    %77 = vector.shape_cast %76 : vector<4x8xf32> to vector<4x8x1xf32>
    %78 = vector.broadcast %77 : vector<4x8x1xf32> to vector<4x8x8xf32>
    %79 = arith.divf %75, %78 : vector<4x8x8xf32>
    %80 = arith.truncf %79 : vector<4x8x8xf32> to vector<4x8x8xbf16>
    "tpu.trace_start"() <{level = 10 : i32, message = "bqk,bkd->bqd"}> : () -> ()
    %cst_32 = arith.constant dense<0.000000e+00> : vector<4x8x16xf32>
    %81 = tpu.matmul %80, %67, %cst_32 {dimension_numbers = #tpu.dot_dimension_numbers<[2], [1], [1], [2], [0, 0, 0, 1, 1, 2], [0], [0]>} : vector<4x8x8xbf16>, vector<4x8x16xbf16>, vector<4x8x16xf32> -> vector<4x8x16xf32>
    "tpu.trace_stop"() : () -> ()
    %82 = vector.shape_cast %81 : vector<4x8x16xf32> to vector<32x16xf32>
    %83 = arith.truncf %82 : vector<32x16xf32> to vector<32x16xbf16>
    %c0_33 = arith.constant 0 : index
    %c1 = arith.constant 1 : index
    %c0_34 = arith.constant 0 : index
    %c0_35 = arith.constant 0 : index
    %84 = vector.load %arg7[%c0_33, %c1, %c0_34, %c0_35] : memref<2x2x16x32xbf16, #tpu.memory_space<vmem>>, vector<1x1x16x32xbf16>
    %85 = vector.shape_cast %84 : vector<1x1x16x32xbf16> to vector<16x32xbf16>
    %cst_36 = arith.constant dense<0.000000e+00> : vector<32x32xf32>
    %86 = tpu.matmul %83, %85, %cst_36 {dimension_numbers = #tpu.dot_dimension_numbers<[1], [0], [0], [1], [0, 0, 1, 1], [], []>} : vector<32x16xbf16>, vector<16x32xbf16>, vector<32x32xf32> -> vector<32x32xf32>
    %87 = arith.addf %61, %86 : vector<32x32xf32>
    %c0_37 = arith.constant 0 : index
    %c0_38 = arith.constant 0 : index
    %c0_39 = arith.constant 0 : index
    %88 = vector.load %arg8[%c0_37, %c0_38, %c0_39] : memref<2x1x32xf32, #tpu.memory_space<vmem>>, vector<1x1x32xf32>
    %89 = vector.shape_cast %88 : vector<1x1x32xf32> to vector<1x32xf32>
    %90 = vector.broadcast %89 : vector<1x32xf32> to vector<32x32xf32>
    %91 = arith.addf %87, %90 : vector<32x32xf32>
    %92 = arith.addf %25, %91 : vector<32x32xf32>
    %c0_40 = arith.constant 0 : index
    %c0_41 = arith.constant 0 : index
    %c0_42 = arith.constant 0 : index
    %93 = vector.load %arg9[%c0_40, %c0_41, %c0_42] : memref<2x1x32xf32, #tpu.memory_space<vmem>>, vector<1x1x32xf32>
    %94 = vector.shape_cast %93 : vector<1x1x32xf32> to vector<1x32xf32>
    %c0_43 = arith.constant 0 : index
    %c0_44 = arith.constant 0 : index
    %c0_45 = arith.constant 0 : index
    %95 = vector.load %arg10[%c0_43, %c0_44, %c0_45] : memref<2x1x32xf32, #tpu.memory_space<vmem>>, vector<1x1x32xf32>
    %96 = vector.shape_cast %95 : vector<1x1x32xf32> to vector<1x32xf32>
    %cst_46 = arith.constant dense<0.000000e+00> : vector<32xf32>
    %97 = vector.multi_reduction <add>, %92, %cst_46 [1] : vector<32x32xf32> to vector<32xf32>
    %98 = vector.shape_cast %97 : vector<32xf32> to vector<32x1xf32>
    %cst_47 = arith.constant 3.200000e+01 : f32
    %99 = vector.broadcast %cst_47 : f32 to vector<32x1xf32>
    %100 = arith.divf %98, %99 : vector<32x1xf32>
    %101 = vector.broadcast %100 : vector<32x1xf32> to vector<32x32xf32>
    %102 = arith.subf %92, %101 : vector<32x32xf32>
    %103 = arith.mulf %102, %102 : vector<32x32xf32>
    %cst_48 = arith.constant dense<0.000000e+00> : vector<32xf32>
    %104 = vector.multi_reduction <add>, %103, %cst_48 [1] : vector<32x32xf32> to vector<32xf32>
    %105 = vector.shape_cast %104 : vector<32xf32> to vector<32x1xf32>
    %cst_49 = arith.constant 3.200000e+01 : f32
    %106 = vector.broadcast %cst_49 : f32 to vector<32x1xf32>
    %107 = arith.divf %105, %106 : vector<32x1xf32>
    %108 = vector.broadcast %100 : vector<32x1xf32> to vector<32x32xf32>
    %109 = arith.subf %92, %108 : vector<32x32xf32>
    %cst_50 = arith.constant 9.99999996E-13 : f32
    %110 = vector.broadcast %cst_50 : f32 to vector<32x1xf32>
    %111 = arith.addf %107, %110 : vector<32x1xf32>
    %112 = math.rsqrt %111 : vector<32x1xf32>
    %113 = vector.broadcast %112 : vector<32x1xf32> to vector<32x32xf32>
    %114 = arith.mulf %109, %113 : vector<32x32xf32>
    %115 = vector.broadcast %94 : vector<1x32xf32> to vector<32x32xf32>
    %116 = arith.mulf %114, %115 : vector<32x32xf32>
    %117 = vector.broadcast %96 : vector<1x32xf32> to vector<32x32xf32>
    %118 = arith.addf %116, %117 : vector<32x32xf32>
    %119 = arith.truncf %118 : vector<32x32xf32> to vector<32x32xbf16>
    %c0_51 = arith.constant 0 : index
    %c0_52 = arith.constant 0 : index
    %c0_53 = arith.constant 0 : index
    %120 = vector.load %arg11[%c0_51, %c0_52, %c0_53] : memref<2x32x64xbf16, #tpu.memory_space<vmem>>, vector<1x32x64xbf16>
    %121 = vector.shape_cast %120 : vector<1x32x64xbf16> to vector<32x64xbf16>
    %cst_54 = arith.constant dense<0.000000e+00> : vector<32x64xf32>
    %122 = tpu.matmul %119, %121, %cst_54 {dimension_numbers = #tpu.dot_dimension_numbers<[1], [0], [0], [1], [0, 0, 1, 1], [], []>} : vector<32x32xbf16>, vector<32x64xbf16>, vector<32x64xf32> -> vector<32x64xf32>
    %c0_55 = arith.constant 0 : index
    %c0_56 = arith.constant 0 : index
    %c0_57 = arith.constant 0 : index
    %123 = vector.load %arg12[%c0_55, %c0_56, %c0_57] : memref<2x1x64xf32, #tpu.memory_space<vmem>>, vector<1x1x64xf32>
    %124 = vector.shape_cast %123 : vector<1x1x64xf32> to vector<1x64xf32>
    %125 = vector.broadcast %124 : vector<1x64xf32> to vector<32x64xf32>
    %126 = arith.addf %122, %125 : vector<32x64xf32>
    %cst_58 = arith.constant 5.000000e-01 : f32
    %127 = vector.broadcast %cst_58 : f32 to vector<32x64xf32>
    %128 = arith.mulf %127, %126 : vector<32x64xf32>
    %cst_59 = arith.constant 4.471500e-02 : f32
    %129 = vector.broadcast %cst_59 : f32 to vector<32x64xf32>
    %130 = arith.mulf %129, %126 : vector<32x64xf32>
    %131 = arith.mulf %130, %126 : vector<32x64xf32>
    %132 = arith.mulf %131, %126 : vector<32x64xf32>
    %133 = arith.addf %126, %132 : vector<32x64xf32>
    %cst_60 = arith.constant 0.797884583 : f32
    %134 = vector.broadcast %cst_60 : f32 to vector<32x64xf32>
    %135 = arith.mulf %134, %133 : vector<32x64xf32>
    %136 = math.tanh %135 : vector<32x64xf32>
    %cst_61 = arith.constant 1.000000e+00 : f32
    %137 = vector.broadcast %cst_61 : f32 to vector<32x64xf32>
    %138 = arith.addf %137, %136 : vector<32x64xf32>
    %139 = arith.mulf %128, %138 : vector<32x64xf32>
    %140 = arith.truncf %139 : vector<32x64xf32> to vector<32x64xbf16>
    %c0_62 = arith.constant 0 : index
    %c0_63 = arith.constant 0 : index
    %c0_64 = arith.constant 0 : index
    %141 = vector.load %arg13[%c0_62, %c0_63, %c0_64] : memref<2x64x32xbf16, #tpu.memory_space<vmem>>, vector<1x64x32xbf16>
    %142 = vector.shape_cast %141 : vector<1x64x32xbf16> to vector<64x32xbf16>
    %cst_65 = arith.constant dense<0.000000e+00> : vector<32x32xf32>
    %143 = tpu.matmul %140, %142, %cst_65 {dimension_numbers = #tpu.dot_dimension_numbers<[1], [0], [0], [1], [0, 0, 1, 1], [], []>} : vector<32x64xbf16>, vector<64x32xbf16>, vector<32x32xf32> -> vector<32x32xf32>
    %c0_66 = arith.constant 0 : index
    %c0_67 = arith.constant 0 : index
    %c0_68 = arith.constant 0 : index
    %144 = vector.load %arg14[%c0_66, %c0_67, %c0_68] : memref<2x1x32xf32, #tpu.memory_space<vmem>>, vector<1x1x32xf32>
    %145 = vector.shape_cast %144 : vector<1x1x32xf32> to vector<1x32xf32>
    %146 = vector.broadcast %145 : vector<1x32xf32> to vector<32x32xf32>
    %147 = arith.addf %143, %146 : vector<32x32xf32>
    %148 = arith.addf %118, %147 : vector<32x32xf32>
    %c0_69 = arith.constant 0 : index
    %c0_70 = arith.constant 0 : index
    %c0_71 = arith.constant 0 : index
    %149 = vector.load %arg15[%c0_69, %c0_70, %c0_71] : memref<2x1x32xf32, #tpu.memory_space<vmem>>, vector<1x1x32xf32>
    %150 = vector.shape_cast %149 : vector<1x1x32xf32> to vector<1x32xf32>
    %c0_72 = arith.constant 0 : index
    %c0_73 = arith.constant 0 : index
    %c0_74 = arith.constant 0 : index
    %151 = vector.load %arg16[%c0_72, %c0_73, %c0_74] : memref<2x1x32xf32, #tpu.memory_space<vmem>>, vector<1x1x32xf32>
    %152 = vector.shape_cast %151 : vector<1x1x32xf32> to vector<1x32xf32>
    %cst_75 = arith.constant dense<0.000000e+00> : vector<32xf32>
    %153 = vector.multi_reduction <add>, %148, %cst_75 [1] : vector<32x32xf32> to vector<32xf32>
    %154 = vector.shape_cast %153 : vector<32xf32> to vector<32x1xf32>
    %cst_76 = arith.constant 3.200000e+01 : f32
    %155 = vector.broadcast %cst_76 : f32 to vector<32x1xf32>
    %156 = arith.divf %154, %155 : vector<32x1xf32>
    %157 = vector.broadcast %156 : vector<32x1xf32> to vector<32x32xf32>
    %158 = arith.subf %148, %157 : vector<32x32xf32>
    %159 = arith.mulf %158, %158 : vector<32x32xf32>
    %cst_77 = arith.constant dense<0.000000e+00> : vector<32xf32>
    %160 = vector.multi_reduction <add>, %159, %cst_77 [1] : vector<32x32xf32> to vector<32xf32>
    %161 = vector.shape_cast %160 : vector<32xf32> to vector<32x1xf32>
    %cst_78 = arith.constant 3.200000e+01 : f32
    %162 = vector.broadcast %cst_78 : f32 to vector<32x1xf32>
    %163 = arith.divf %161, %162 : vector<32x1xf32>
    %164 = vector.broadcast %156 : vector<32x1xf32> to vector<32x32xf32>
    %165 = arith.subf %148, %164 : vector<32x32xf32>
    %cst_79 = arith.constant 9.99999996E-13 : f32
    %166 = vector.broadcast %cst_79 : f32 to vector<32x1xf32>
    %167 = arith.addf %163, %166 : vector<32x1xf32>
    %168 = math.rsqrt %167 : vector<32x1xf32>
    %169 = vector.broadcast %168 : vector<32x1xf32> to vector<32x32xf32>
    %170 = arith.mulf %165, %169 : vector<32x32xf32>
    %171 = vector.broadcast %150 : vector<1x32xf32> to vector<32x32xf32>
    %172 = arith.mulf %170, %171 : vector<32x32xf32>
    %173 = vector.broadcast %152 : vector<1x32xf32> to vector<32x32xf32>
    %174 = arith.addf %172, %173 : vector<32x32xf32>
    %175 = arith.truncf %174 : vector<32x32xf32> to vector<32x32xbf16>
    %c1_80 = arith.constant 1 : index
    %c0_81 = arith.constant 0 : index
    %c0_82 = arith.constant 0 : index
    %176 = vector.load %arg5[%c1_80, %c0_81, %c0_82] : memref<2x32x96xbf16, #tpu.memory_space<vmem>>, vector<1x32x96xbf16>
    %177 = vector.shape_cast %176 : vector<1x32x96xbf16> to vector<32x96xbf16>
    %cst_83 = arith.constant dense<0.000000e+00> : vector<32x96xf32>
    %178 = tpu.matmul %175, %177, %cst_83 {dimension_numbers = #tpu.dot_dimension_numbers<[1], [0], [0], [1], [0, 0, 1, 1], [], []>} : vector<32x32xbf16>, vector<32x96xbf16>, vector<32x96xf32> -> vector<32x96xf32>
    %c1_84 = arith.constant 1 : index
    %c0_85 = arith.constant 0 : index
    %c0_86 = arith.constant 0 : index
    %179 = vector.load %arg6[%c1_84, %c0_85, %c0_86] : memref<2x1x96xf32, #tpu.memory_space<vmem>>, vector<1x1x96xf32>
    %180 = vector.shape_cast %179 : vector<1x1x96xf32> to vector<1x96xf32>
    %181 = vector.broadcast %180 : vector<1x96xf32> to vector<32x96xf32>
    %182 = arith.addf %178, %181 : vector<32x96xf32>
    %183 = vector.shape_cast %182 : vector<32x96xf32> to vector<4x8x96xf32>
    %cst_87 = arith.constant 0.000000e+00 : f32
    %184 = vector.broadcast %cst_87 : f32 to vector<32x32xf32>
    %185 = vector.extract_strided_slice %183 {offsets = [0, 0, 0], sizes = [4, 8, 16], strides = [1, 1, 1]} : vector<4x8x96xf32> to vector<4x8x16xf32>
    %186 = arith.truncf %185 : vector<4x8x16xf32> to vector<4x8x16xbf16>
    %187 = vector.extract_strided_slice %183 {offsets = [0, 0, 32], sizes = [4, 8, 16], strides = [1, 1, 1]} : vector<4x8x96xf32> to vector<4x8x16xf32>
    %188 = arith.truncf %187 : vector<4x8x16xf32> to vector<4x8x16xbf16>
    %189 = vector.extract_strided_slice %183 {offsets = [0, 0, 64], sizes = [4, 8, 16], strides = [1, 1, 1]} : vector<4x8x96xf32> to vector<4x8x16xf32>
    %190 = arith.truncf %189 : vector<4x8x16xf32> to vector<4x8x16xbf16>
    "tpu.trace_start"() <{level = 10 : i32, message = "bqd,bkd->bqk"}> : () -> ()
    %cst_88 = arith.constant dense<0.000000e+00> : vector<4x8x8xf32>
    %191 = tpu.matmul %186, %188, %cst_88 {dimension_numbers = #tpu.dot_dimension_numbers<[2], [2], [1], [1], [0, 0, 0, 1, 1, 1], [0], [0]>} : vector<4x8x16xbf16>, vector<4x8x16xbf16>, vector<4x8x8xf32> -> vector<4x8x8xf32>
    "tpu.trace_stop"() : () -> ()
    %192 = vector.broadcast %1 : vector<4x1x8xf32> to vector<4x8x8xf32>
    %193 = arith.addf %191, %192 : vector<4x8x8xf32>
    %cst_89 = arith.constant dense<0xFF800000> : vector<4x8xf32>
    %194 = vector.multi_reduction <maximumf>, %193, %cst_89 [2] : vector<4x8x8xf32> to vector<4x8xf32>
    %195 = vector.shape_cast %194 : vector<4x8xf32> to vector<4x8x1xf32>
    %196 = vector.broadcast %195 : vector<4x8x1xf32> to vector<4x8x8xf32>
    %197 = arith.subf %193, %196 : vector<4x8x8xf32>
    %198 = math.exp %197 : vector<4x8x8xf32>
    %cst_90 = arith.constant dense<0.000000e+00> : vector<4x8xf32>
    %199 = vector.multi_reduction <add>, %198, %cst_90 [2] : vector<4x8x8xf32> to vector<4x8xf32>
    %200 = vector.shape_cast %199 : vector<4x8xf32> to vector<4x8x1xf32>
    %201 = vector.broadcast %200 : vector<4x8x1xf32> to vector<4x8x8xf32>
    %202 = arith.divf %198, %201 : vector<4x8x8xf32>
    %203 = arith.truncf %202 : vector<4x8x8xf32> to vector<4x8x8xbf16>
    "tpu.trace_start"() <{level = 10 : i32, message = "bqk,bkd->bqd"}> : () -> ()
    %cst_91 = arith.constant dense<0.000000e+00> : vector<4x8x16xf32>
    %204 = tpu.matmul %203, %190, %cst_91 {dimension_numbers = #tpu.dot_dimension_numbers<[2], [1], [1], [2], [0, 0, 0, 1, 1, 2], [0], [0]>} : vector<4x8x8xbf16>, vector<4x8x16xbf16>, vector<4x8x16xf32> -> vector<4x8x16xf32>
    "tpu.trace_stop"() : () -> ()
    %205 = vector.shape_cast %204 : vector<4x8x16xf32> to vector<32x16xf32>
    %206 = arith.truncf %205 : vector<32x16xf32> to vector<32x16xbf16>
    %c1_92 = arith.constant 1 : index
    %c0_93 = arith.constant 0 : index
    %c0_94 = arith.constant 0 : index
    %c0_95 = arith.constant 0 : index
    %207 = vector.load %arg7[%c1_92, %c0_93, %c0_94, %c0_95] : memref<2x2x16x32xbf16, #tpu.memory_space<vmem>>, vector<1x1x16x32xbf16>
    %208 = vector.shape_cast %207 : vector<1x1x16x32xbf16> to vector<16x32xbf16>
    %cst_96 = arith.constant dense<0.000000e+00> : vector<32x32xf32>
    %209 = tpu.matmul %206, %208, %cst_96 {dimension_numbers = #tpu.dot_dimension_numbers<[1], [0], [0], [1], [0, 0, 1, 1], [], []>} : vector<32x16xbf16>, vector<16x32xbf16>, vector<32x32xf32> -> vector<32x32xf32>
    %210 = arith.addf %184, %209 : vector<32x32xf32>
    %211 = vector.extract_strided_slice %183 {offsets = [0, 0, 16], sizes = [4, 8, 16], strides = [1, 1, 1]} : vector<4x8x96xf32> to vector<4x8x16xf32>
    %212 = arith.truncf %211 : vector<4x8x16xf32> to vector<4x8x16xbf16>
    %213 = vector.extract_strided_slice %183 {offsets = [0, 0, 48], sizes = [4, 8, 16], strides = [1, 1, 1]} : vector<4x8x96xf32> to vector<4x8x16xf32>
    %214 = arith.truncf %213 : vector<4x8x16xf32> to vector<4x8x16xbf16>
    %215 = vector.extract_strided_slice %183 {offsets = [0, 0, 80], sizes = [4, 8, 16], strides = [1, 1, 1]} : vector<4x8x96xf32> to vector<4x8x16xf32>
    %216 = arith.truncf %215 : vector<4x8x16xf32> to vector<4x8x16xbf16>
    "tpu.trace_start"() <{level = 10 : i32, message = "bqd,bkd->bqk"}> : () -> ()
    %cst_97 = arith.constant dense<0.000000e+00> : vector<4x8x8xf32>
    %217 = tpu.matmul %212, %214, %cst_97 {dimension_numbers = #tpu.dot_dimension_numbers<[2], [2], [1], [1], [0, 0, 0, 1, 1, 1], [0], [0]>} : vector<4x8x16xbf16>, vector<4x8x16xbf16>, vector<4x8x8xf32> -> vector<4x8x8xf32>
    "tpu.trace_stop"() : () -> ()
    %218 = vector.broadcast %1 : vector<4x1x8xf32> to vector<4x8x8xf32>
    %219 = arith.addf %217, %218 : vector<4x8x8xf32>
    %cst_98 = arith.constant dense<0xFF800000> : vector<4x8xf32>
    %220 = vector.multi_reduction <maximumf>, %219, %cst_98 [2] : vector<4x8x8xf32> to vector<4x8xf32>
    %221 = vector.shape_cast %220 : vector<4x8xf32> to vector<4x8x1xf32>
    %222 = vector.broadcast %221 : vector<4x8x1xf32> to vector<4x8x8xf32>
    %223 = arith.subf %219, %222 : vector<4x8x8xf32>
    %224 = math.exp %223 : vector<4x8x8xf32>
    %cst_99 = arith.constant dense<0.000000e+00> : vector<4x8xf32>
    %225 = vector.multi_reduction <add>, %224, %cst_99 [2] : vector<4x8x8xf32> to vector<4x8xf32>
    %226 = vector.shape_cast %225 : vector<4x8xf32> to vector<4x8x1xf32>
    %227 = vector.broadcast %226 : vector<4x8x1xf32> to vector<4x8x8xf32>
    %228 = arith.divf %224, %227 : vector<4x8x8xf32>
    %229 = arith.truncf %228 : vector<4x8x8xf32> to vector<4x8x8xbf16>
    "tpu.trace_start"() <{level = 10 : i32, message = "bqk,bkd->bqd"}> : () -> ()
    %cst_100 = arith.constant dense<0.000000e+00> : vector<4x8x16xf32>
    %230 = tpu.matmul %229, %216, %cst_100 {dimension_numbers = #tpu.dot_dimension_numbers<[2], [1], [1], [2], [0, 0, 0, 1, 1, 2], [0], [0]>} : vector<4x8x8xbf16>, vector<4x8x16xbf16>, vector<4x8x16xf32> -> vector<4x8x16xf32>
    "tpu.trace_stop"() : () -> ()
    %231 = vector.shape_cast %230 : vector<4x8x16xf32> to vector<32x16xf32>
    %232 = arith.truncf %231 : vector<32x16xf32> to vector<32x16xbf16>
    %c1_101 = arith.constant 1 : index
    %c1_102 = arith.constant 1 : index
    %c0_103 = arith.constant 0 : index
    %c0_104 = arith.constant 0 : index
    %233 = vector.load %arg7[%c1_101, %c1_102, %c0_103, %c0_104] : memref<2x2x16x32xbf16, #tpu.memory_space<vmem>>, vector<1x1x16x32xbf16>
    %234 = vector.shape_cast %233 : vector<1x1x16x32xbf16> to vector<16x32xbf16>
    %cst_105 = arith.constant dense<0.000000e+00> : vector<32x32xf32>
    %235 = tpu.matmul %232, %234, %cst_105 {dimension_numbers = #tpu.dot_dimension_numbers<[1], [0], [0], [1], [0, 0, 1, 1], [], []>} : vector<32x16xbf16>, vector<16x32xbf16>, vector<32x32xf32> -> vector<32x32xf32>
    %236 = arith.addf %210, %235 : vector<32x32xf32>
    %c1_106 = arith.constant 1 : index
    %c0_107 = arith.constant 0 : index
    %c0_108 = arith.constant 0 : index
    %237 = vector.load %arg8[%c1_106, %c0_107, %c0_108] : memref<2x1x32xf32, #tpu.memory_space<vmem>>, vector<1x1x32xf32>
    %238 = vector.shape_cast %237 : vector<1x1x32xf32> to vector<1x32xf32>
    %239 = vector.broadcast %238 : vector<1x32xf32> to vector<32x32xf32>
    %240 = arith.addf %236, %239 : vector<32x32xf32>
    %241 = arith.addf %174, %240 : vector<32x32xf32>
    %c1_109 = arith.constant 1 : index
    %c0_110 = arith.constant 0 : index
    %c0_111 = arith.constant 0 : index
    %242 = vector.load %arg9[%c1_109, %c0_110, %c0_111] : memref<2x1x32xf32, #tpu.memory_space<vmem>>, vector<1x1x32xf32>
    %243 = vector.shape_cast %242 : vector<1x1x32xf32> to vector<1x32xf32>
    %c1_112 = arith.constant 1 : index
    %c0_113 = arith.constant 0 : index
    %c0_114 = arith.constant 0 : index
    %244 = vector.load %arg10[%c1_112, %c0_113, %c0_114] : memref<2x1x32xf32, #tpu.memory_space<vmem>>, vector<1x1x32xf32>
    %245 = vector.shape_cast %244 : vector<1x1x32xf32> to vector<1x32xf32>
    %cst_115 = arith.constant dense<0.000000e+00> : vector<32xf32>
    %246 = vector.multi_reduction <add>, %241, %cst_115 [1] : vector<32x32xf32> to vector<32xf32>
    %247 = vector.shape_cast %246 : vector<32xf32> to vector<32x1xf32>
    %cst_116 = arith.constant 3.200000e+01 : f32
    %248 = vector.broadcast %cst_116 : f32 to vector<32x1xf32>
    %249 = arith.divf %247, %248 : vector<32x1xf32>
    %250 = vector.broadcast %249 : vector<32x1xf32> to vector<32x32xf32>
    %251 = arith.subf %241, %250 : vector<32x32xf32>
    %252 = arith.mulf %251, %251 : vector<32x32xf32>
    %cst_117 = arith.constant dense<0.000000e+00> : vector<32xf32>
    %253 = vector.multi_reduction <add>, %252, %cst_117 [1] : vector<32x32xf32> to vector<32xf32>
    %254 = vector.shape_cast %253 : vector<32xf32> to vector<32x1xf32>
    %cst_118 = arith.constant 3.200000e+01 : f32
    %255 = vector.broadcast %cst_118 : f32 to vector<32x1xf32>
    %256 = arith.divf %254, %255 : vector<32x1xf32>
    %257 = vector.broadcast %249 : vector<32x1xf32> to vector<32x32xf32>
    %258 = arith.subf %241, %257 : vector<32x32xf32>
    %cst_119 = arith.constant 9.99999996E-13 : f32
    %259 = vector.broadcast %cst_119 : f32 to vector<32x1xf32>
    %260 = arith.addf %256, %259 : vector<32x1xf32>
    %261 = math.rsqrt %260 : vector<32x1xf32>
    %262 = vector.broadcast %261 : vector<32x1xf32> to vector<32x32xf32>
    %263 = arith.mulf %258, %262 : vector<32x32xf32>
    %264 = vector.broadcast %243 : vector<1x32xf32> to vector<32x32xf32>
    %265 = arith.mulf %263, %264 : vector<32x32xf32>
    %266 = vector.broadcast %245 : vector<1x32xf32> to vector<32x32xf32>
    %267 = arith.addf %265, %266 : vector<32x32xf32>
    %268 = arith.truncf %267 : vector<32x32xf32> to vector<32x32xbf16>
    %c1_120 = arith.constant 1 : index
    %c0_121 = arith.constant 0 : index
    %c0_122 = arith.constant 0 : index
    %269 = vector.load %arg11[%c1_120, %c0_121, %c0_122] : memref<2x32x64xbf16, #tpu.memory_space<vmem>>, vector<1x32x64xbf16>
    %270 = vector.shape_cast %269 : vector<1x32x64xbf16> to vector<32x64xbf16>
    %cst_123 = arith.constant dense<0.000000e+00> : vector<32x64xf32>
    %271 = tpu.matmul %268, %270, %cst_123 {dimension_numbers = #tpu.dot_dimension_numbers<[1], [0], [0], [1], [0, 0, 1, 1], [], []>} : vector<32x32xbf16>, vector<32x64xbf16>, vector<32x64xf32> -> vector<32x64xf32>
    %c1_124 = arith.constant 1 : index
    %c0_125 = arith.constant 0 : index
    %c0_126 = arith.constant 0 : index
    %272 = vector.load %arg12[%c1_124, %c0_125, %c0_126] : memref<2x1x64xf32, #tpu.memory_space<vmem>>, vector<1x1x64xf32>
    %273 = vector.shape_cast %272 : vector<1x1x64xf32> to vector<1x64xf32>
    %274 = vector.broadcast %273 : vector<1x64xf32> to vector<32x64xf32>
    %275 = arith.addf %271, %274 : vector<32x64xf32>
    %cst_127 = arith.constant 5.000000e-01 : f32
    %276 = vector.broadcast %cst_127 : f32 to vector<32x64xf32>
    %277 = arith.mulf %276, %275 : vector<32x64xf32>
    %cst_128 = arith.constant 4.471500e-02 : f32
    %278 = vector.broadcast %cst_128 : f32 to vector<32x64xf32>
    %279 = arith.mulf %278, %275 : vector<32x64xf32>
    %280 = arith.mulf %279, %275 : vector<32x64xf32>
    %281 = arith.mulf %280, %275 : vector<32x64xf32>
    %282 = arith.addf %275, %281 : vector<32x64xf32>
    %cst_129 = arith.constant 0.797884583 : f32
    %283 = vector.broadcast %cst_129 : f32 to vector<32x64xf32>
    %284 = arith.mulf %283, %282 : vector<32x64xf32>
    %285 = math.tanh %284 : vector<32x64xf32>
    %cst_130 = arith.constant 1.000000e+00 : f32
    %286 = vector.broadcast %cst_130 : f32 to vector<32x64xf32>
    %287 = arith.addf %286, %285 : vector<32x64xf32>
    %288 = arith.mulf %277, %287 : vector<32x64xf32>
    %289 = arith.truncf %288 : vector<32x64xf32> to vector<32x64xbf16>
    %c1_131 = arith.constant 1 : index
    %c0_132 = arith.constant 0 : index
    %c0_133 = arith.constant 0 : index
    %290 = vector.load %arg13[%c1_131, %c0_132, %c0_133] : memref<2x64x32xbf16, #tpu.memory_space<vmem>>, vector<1x64x32xbf16>
    %291 = vector.shape_cast %290 : vector<1x64x32xbf16> to vector<64x32xbf16>
    %cst_134 = arith.constant dense<0.000000e+00> : vector<32x32xf32>
    %292 = tpu.matmul %289, %291, %cst_134 {dimension_numbers = #tpu.dot_dimension_numbers<[1], [0], [0], [1], [0, 0, 1, 1], [], []>} : vector<32x64xbf16>, vector<64x32xbf16>, vector<32x32xf32> -> vector<32x32xf32>
    %c1_135 = arith.constant 1 : index
    %c0_136 = arith.constant 0 : index
    %c0_137 = arith.constant 0 : index
    %293 = vector.load %arg14[%c1_135, %c0_136, %c0_137] : memref<2x1x32xf32, #tpu.memory_space<vmem>>, vector<1x1x32xf32>
    %294 = vector.shape_cast %293 : vector<1x1x32xf32> to vector<1x32xf32>
    %295 = vector.broadcast %294 : vector<1x32xf32> to vector<32x32xf32>
    %296 = arith.addf %292, %295 : vector<32x32xf32>
    %297 = arith.addf %267, %296 : vector<32x32xf32>
    %c1_138 = arith.constant 1 : index
    %c0_139 = arith.constant 0 : index
    %c0_140 = arith.constant 0 : index
    %298 = vector.load %arg15[%c1_138, %c0_139, %c0_140] : memref<2x1x32xf32, #tpu.memory_space<vmem>>, vector<1x1x32xf32>
    %299 = vector.shape_cast %298 : vector<1x1x32xf32> to vector<1x32xf32>
    %c1_141 = arith.constant 1 : index
    %c0_142 = arith.constant 0 : index
    %c0_143 = arith.constant 0 : index
    %300 = vector.load %arg16[%c1_141, %c0_142, %c0_143] : memref<2x1x32xf32, #tpu.memory_space<vmem>>, vector<1x1x32xf32>
    %301 = vector.shape_cast %300 : vector<1x1x32xf32> to vector<1x32xf32>
    %cst_144 = arith.constant dense<0.000000e+00> : vector<32xf32>
    %302 = vector.multi_reduction <add>, %297, %cst_144 [1] : vector<32x32xf32> to vector<32xf32>
    %303 = vector.shape_cast %302 : vector<32xf32> to vector<32x1xf32>
    %cst_145 = arith.constant 3.200000e+01 : f32
    %304 = vector.broadcast %cst_145 : f32 to vector<32x1xf32>
    %305 = arith.divf %303, %304 : vector<32x1xf32>
    %306 = vector.broadcast %305 : vector<32x1xf32> to vector<32x32xf32>
    %307 = arith.subf %297, %306 : vector<32x32xf32>
    %308 = arith.mulf %307, %307 : vector<32x32xf32>
    %cst_146 = arith.constant dense<0.000000e+00> : vector<32xf32>
    %309 = vector.multi_reduction <add>, %308, %cst_146 [1] : vector<32x32xf32> to vector<32xf32>
    %310 = vector.shape_cast %309 : vector<32xf32> to vector<32x1xf32>
    %cst_147 = arith.constant 3.200000e+01 : f32
    %311 = vector.broadcast %cst_147 : f32 to vector<32x1xf32>
    %312 = arith.divf %310, %311 : vector<32x1xf32>
    %313 = vector.broadcast %305 : vector<32x1xf32> to vector<32x32xf32>
    %314 = arith.subf %297, %313 : vector<32x32xf32>
    %cst_148 = arith.constant 9.99999996E-13 : f32
    %315 = vector.broadcast %cst_148 : f32 to vector<32x1xf32>
    %316 = arith.addf %312, %315 : vector<32x1xf32>
    %317 = math.rsqrt %316 : vector<32x1xf32>
    %318 = vector.broadcast %317 : vector<32x1xf32> to vector<32x32xf32>
    %319 = arith.mulf %314, %318 : vector<32x32xf32>
    %320 = vector.broadcast %299 : vector<1x32xf32> to vector<32x32xf32>
    %321 = arith.mulf %319, %320 : vector<32x32xf32>
    %322 = vector.broadcast %301 : vector<1x32xf32> to vector<32x32xf32>
    %323 = arith.addf %321, %322 : vector<32x32xf32>
    %c0_149 = arith.constant 0 : index
    %c0_150 = arith.constant 0 : index
    %324 = vector.load %arg17[%c0_149, %c0_150] : memref<32x32xf32, #tpu.memory_space<vmem>>, vector<32x32xf32>
    tpu.vector_store %arg17[%c0_149, %c0_150], %174 {strides = array<i32>} : memref<32x32xf32, #tpu.memory_space<vmem>>, vector<32x32xf32>,
    %c0_151 = arith.constant 0 : index
    %c0_152 = arith.constant 0 : index
    %325 = vector.load %arg18[%c0_151, %c0_152] : memref<32x32xf32, #tpu.memory_space<vmem>>, vector<32x32xf32>
    tpu.vector_store %arg18[%c0_151, %c0_152], %323 {strides = array<i32>} : memref<32x32xf32, #tpu.memory_space<vmem>>, vector<32x32xf32>,
    return
  }
  func.func @transform_0(%arg0: i32) -> (i32, i32) {
    %c0_i32 = arith.constant 0 : i32
    %c0_i32_0 = arith.constant 0 : i32
    return %arg0, %c0_i32 : i32, i32
  }
  func.func @transform_1(%arg0: i32) -> (i32, i32, i32) {
    %c0_i32 = arith.constant 0 : i32
    %c0_i32_0 = arith.constant 0 : i32
    %c0_i32_1 = arith.constant 0 : i32
    return %arg0, %c0_i32, %c0_i32_0 : i32, i32, i32
  }
  func.func @transform_2(%arg0: i32) -> (i32, i32) {
    %c0_i32 = arith.constant 0 : i32
    %c0_i32_0 = arith.constant 0 : i32
    %c0_i32_1 = arith.constant 0 : i32
    return %c0_i32, %c0_i32_0 : i32, i32
  }
  func.func @transform_3(%arg0: i32) -> (i32, i32) {
    %c0_i32 = arith.constant 0 : i32
    %c0_i32_0 = arith.constant 0 : i32
    %c0_i32_1 = arith.constant 0 : i32
    return %c0_i32, %c0_i32_0 : i32, i32
  }
  func.func @transform_4(%arg0: i32) -> (i32, i32, i32) {
    %c0_i32 = arith.constant 0 : i32
    %c0_i32_0 = arith.constant 0 : i32
    %c0_i32_1 = arith.constant 0 : i32
    %c0_i32_2 = arith.constant 0 : i32
    return %c0_i32, %c0_i32_0, %c0_i32_1 : i32, i32, i32
  }
  func.func @transform_5(%arg0: i32) -> (i32, i32, i32) {
    %c0_i32 = arith.constant 0 : i32
    %c0_i32_0 = arith.constant 0 : i32
    %c0_i32_1 = arith.constant 0 : i32
    %c0_i32_2 = arith.constant 0 : i32
    return %c0_i32, %c0_i32_0, %c0_i32_1 : i32, i32, i32
  }
  func.func @transform_6(%arg0: i32) -> (i32, i32, i32, i32) {
    %c0_i32 = arith.constant 0 : i32
    %c0_i32_0 = arith.constant 0 : i32
    %c0_i32_1 = arith.constant 0 : i32
    %c0_i32_2 = arith.constant 0 : i32
    %c0_i32_3 = arith.constant 0 : i32
    return %c0_i32, %c0_i32_0, %c0_i32_1, %c0_i32_2 : i32, i32, i32, i32
  }
  func.func @transform_7(%arg0: i32) -> (i32, i32, i32) {
    %c0_i32 = arith.constant 0 : i32
    %c0_i32_0 = arith.constant 0 : i32
    %c0_i32_1 = arith.constant 0 : i32
    %c0_i32_2 = arith.constant 0 : i32
    return %c0_i32, %c0_i32_0, %c0_i32_1 : i32, i32, i32
  }
  func.func @transform_8(%arg0: i32) -> (i32, i32, i32) {
    %c0_i32 = arith.constant 0 : i32
    %c0_i32_0 = arith.constant 0 : i32
    %c0_i32_1 = arith.constant 0 : i32
    %c0_i32_2 = arith.constant 0 : i32
    return %c0_i32, %c0_i32_0, %c0_i32_1 : i32, i32, i32
  }
  func.func @transform_9(%arg0: i32) -> (i32, i32, i32) {
    %c0_i32 = arith.constant 0 : i32
    %c0_i32_0 = arith.constant 0 : i32
    %c0_i32_1 = arith.constant 0 : i32
    %c0_i32_2 = arith.constant 0 : i32
    return %c0_i32, %c0_i32_0, %c0_i32_1 : i32, i32, i32
  }
  func.func @transform_10(%arg0: i32) -> (i32, i32, i32) {
    %c0_i32 = arith.constant 0 : i32
    %c0_i32_0 = arith.constant 0 : i32
    %c0_i32_1 = arith.constant 0 : i32
    %c0_i32_2 = arith.constant 0 : i32
    return %c0_i32, %c0_i32_0, %c0_i32_1 : i32, i32, i32
  }
  func.func @transform_11(%arg0: i32) -> (i32, i32, i32) {
    %c0_i32 = arith.constant 0 : i32
    %c0_i32_0 = arith.constant 0 : i32
    %c0_i32_1 = arith.constant 0 : i32
    %c0_i32_2 = arith.constant 0 : i32
    return %c0_i32, %c0_i32_0, %c0_i32_1 : i32, i32, i32
  }
  func.func @transform_12(%arg0: i32) -> (i32, i32, i32) {
    %c0_i32 = arith.constant 0 : i32
    %c0_i32_0 = arith.constant 0 : i32
    %c0_i32_1 = arith.constant 0 : i32
    %c0_i32_2 = arith.constant 0 : i32
    return %c0_i32, %c0_i32_0, %c0_i32_1 : i32, i32, i32
  }
  func.func @transform_13(%arg0: i32) -> (i32, i32, i32) {
    %c0_i32 = arith.constant 0 : i32
    %c0_i32_0 = arith.constant 0 : i32
    %c0_i32_1 = arith.constant 0 : i32
    %c0_i32_2 = arith.constant 0 : i32
    return %c0_i32, %c0_i32_0, %c0_i32_1 : i32, i32, i32
  }
  func.func @transform_14(%arg0: i32) -> (i32, i32, i32) {
    %c0_i32 = arith.constant 0 : i32
    %c0_i32_0 = arith.constant 0 : i32
    %c0_i32_1 = arith.constant 0 : i32
    %c0_i32_2 = arith.constant 0 : i32
    return %c0_i32, %c0_i32_0, %c0_i32_1 : i32, i32, i32
  }
  func.func @transform_15(%arg0: i32) -> (i32, i32, i32) {
    %c0_i32 = arith.constant 0 : i32
    %c0_i32_0 = arith.constant 0 : i32
    %c0_i32_1 = arith.constant 0 : i32
    %c0_i32_2 = arith.constant 0 : i32
    return %c0_i32, %c0_i32_0, %c0_i32_1 : i32, i32, i32
  }
  func.func @transform_16(%arg0: i32) -> (i32, i32) {
    %c0_i32 = arith.constant 0 : i32
    %c0_i32_0 = arith.constant 0 : i32
    return %arg0, %c0_i32 : i32, i32
  }
  func.func @transform_17(%arg0: i32) -> (i32, i32) {
    %c0_i32 = arith.constant 0 : i32
    %c0_i32_0 = arith.constant 0 : i32
    return %arg0, %c0_i32 : i32, i32
  }
}

</mosaic_0001>

<bundles_post_ra>
// kernel: tpu_custom_call.1
= control target key start
LH: loop header
LB: loop body
LE: loop exit
PB: predicated region body
PF: predicated region fallthrough
CT: control target
= control target key end

     0   :  { %s4746_s0 = inlined_call_operand.vmem [shape: f32[32,32], index: 0, kind: input, shape index: {}]   ;;  %s4747_s1 = inlined_call_operand.hbm [shape: f32[4,1,8], index: 1, kind: input, shape index: {}]   ;;  %s4748_s2 = inlined_call_operand.hbm [shape: f32[1,32], index: 2, kind: input, shape index: {}]   ;;  %s4749_s3 = inlined_call_operand.hbm [shape: f32[1,32], index: 3, kind: input, shape index: {}]   ;;  %s4750_s4 = inlined_call_operand.vmem [shape: bf16[2,32,96], index: 4, kind: input, shape index: {}]   ;;  %s4751_s5 = inlined_call_operand.vmem [shape: f32[2,1,96], index: 5, kind: input, shape index: {}]   ;;  %s4752_s6 = inlined_call_operand.vmem [shape: bf16[2,2,16,32], index: 6, kind: input, shape index: {}]   ;;  %s4753_s7 = inlined_call_operand.vmem [shape: f32[2,1,32], index: 7, kind: input, shape index: {}]   ;;  %s4754_s8 = inlined_call_operand.vmem [shape: f32[2,1,32], index: 8, kind: input, shape index: {}]   ;;  %s4755_s9 = inlined_call_operand.vmem [shape: f32[2,1,32], index: 9, kind: input, shape index: {}]   ;;  %s4756_s10 = inlined_call_operand.hbm [shape: bf16[2,32,64], index: 10, kind: input, shape index: {}]   ;;  %s4757_s11 = inlined_call_operand.vmem [shape: f32[2,1,64], index: 11, kind: input, shape index: {}]   ;;  %s4758_s12 = inlined_call_operand.vmem [shape: bf16[2,64,32], index: 12, kind: input, shape index: {}]   ;;  %s4759_s13 = inlined_call_operand.vmem [shape: f32[2,1,32], index: 13, kind: input, shape index: {}]   ;;  %s4760_s14 = inlined_call_operand.vmem [shape: f32[2,1,32], index: 14, kind: input, shape index: {}]   ;;  %s4761_s15 = inlined_call_operand.vmem [shape: f32[2,1,32], index: 15, kind: input, shape index: {}]   ;;  %s4762_s16 = inlined_call_operand.hbm [shape: f32[32,32], index: 16, kind: output, shape index: {0}]   ;;  %s4763_s17 = inlined_call_operand.hbm [shape: f32[32,32], index: 17, kind: output, shape index: {1}]  }
   0x1   :  { %4765 = sst [smem:[#allocation18_spill]] %s4746_s0 }
   0x2   :  { %4766 = sst [smem:[#allocation19_spill]] %s4747_s1 }
   0x3   :  { %23 = vsyncpa [#allocation3], 0 }
   0x4   :  { %24 = vsyncpa [#allocation6], 0 }
   0x5   :  { %25 = vsyncpa [#allocation9], 0 }
   0x6   :  { %26 = vsyncpa [#allocation4], 0 }
   0x7   :  { %27 = vsyncpa [#allocation12], 0  ;;  %s4004_s24 = smov [#allocation5]   ;;  %s4005_s26 = smov [#allocation2]  }
   0x8   :  { %s48_s25 = sshll.u32 %s4004_s24, 4  ;;  %s35_s27 = sshll.u32 %s4005_s26, 4  ;;  %s49_s25 = int_to_ptr.vmem [resolvable:$true] %s48_s25  ;;  %s36_s27 = int_to_ptr.vmem [resolvable:$true] %s35_s27 }
   0x9   :  { %s3882_s28 = scalar_lea.vmem %s49_s25, 16  ;;  %s3886_s29 = scalar_lea.vmem %s49_s25, 32 }
   0xa   :  { %p3883_p0 = scmp.ne.s32.totalorder %s49_s25, %s3882_s28  ;;  %p3887_p1 = scmp.lt.s32.totalorder %s49_s25, %s49_s25 }
   0xb   :  { %p3888_p2 = scmp.lt.s32.totalorder %s3886_s29, %s3882_s28 }
   0xd   :  { %p3889_p3 = por %p3888_p2, %p3887_p1 }
   0xf   :  { %p3890_p4 = pnand %p3889_p3, %p3883_p0 }
  0x11   :  { %3893 = shalt.err (!%p3890_p4)
}
  0x12   :  { %51 = dma.hbm_to_vmem [thread:$0]  %s4748_s2, 16, %s49_s25, [#allocation6]  }
  0x13   :  { %s3902_s18 = scalar_lea.vmem %s36_s27, 64  ;;  %p3907_p6 = scmp.lt.s32.totalorder %s36_s27, %s36_s27 }
  0x14   :  { %p3903_p5 = scmp.ne.s32.totalorder %s36_s27, %s3902_s18  ;;  %p3908_p7 = scmp.lt.s32.totalorder %s3902_s18, %s3902_s18 }
  0x16   :  { %p3909_p8 = por %p3908_p7, %p3907_p6 }
  0x18   :  { %p3910_p9 = pnand %p3909_p8, %p3903_p5 }
  0x1a   :  { %3913 = shalt.err (!%p3910_p9)
}
  0x1b   :  { %s4006_s19 = smov 16   ;;  %s4007_s1 = smov 1  }
  0x1c   :  { %s4767_s22 = sld [smem:[#allocation19_spill]]  ;;  %s4008_s23 = smov [#allocation7]  }
  0x1d   :  { %s58_s24 = sshll.u32 %s4008_s23, 4  ;;  %s4009_s26 = smov [#allocation8]   ;;  %s59_s24 = int_to_ptr.vmem [resolvable:$true] %s58_s24 }
  0x1e   :  { %s79_s28 = sshll.u32 %s4009_s26, 4  ;;  %s3922_s2 = scalar_lea.vmem %s59_s24, 16  ;;  %s80_s28 = int_to_ptr.vmem [resolvable:$true] %s79_s28 }
  0x1f   :  { %p3923_p10 = scmp.ne.s32.totalorder %s59_s24, %s3922_s2  ;;  %s3926_s25 = scalar_lea.vmem %s59_s24, 32 }
  0x20   :  { %p3927_p11 = scmp.lt.s32.totalorder %s59_s24, %s59_s24  ;;  %p3928_p12 = scmp.lt.s32.totalorder %s3926_s25, %s3922_s2 }
  0x22   :  { %41 = dma.hbm_to_vmem [thread:$0]  %s4767_s22, 64, %s36_s27, [#allocation3], %s4006_s19, %s4006_s19, %s4007_s1  }
  0x23   :  { %p3929_p13 = por %p3928_p12, %p3927_p11 }
  0x25   :  { %p3930_p0 = pnand %p3929_p13, %p3923_p10 }
  0x27   :  { %3933 = shalt.err (!%p3930_p0)
}
  0x28   :  { %61 = dma.hbm_to_vmem [thread:$0]  %s4749_s3, 16, %s59_s24, [#allocation6]  }
  0x29   :  { %s3942_s30 = scalar_lea.vmem %s80_s28, 512  ;;  %p3947_p2 = scmp.lt.s32.totalorder %s80_s28, %s80_s28 }
  0x2a   :  { %p3943_p1 = scmp.ne.s32.totalorder %s80_s28, %s3942_s30  ;;  %p3948_p3 = scmp.lt.s32.totalorder %s3942_s30, %s3942_s30 }
  0x2c   :  { %p3949_p4 = por %p3948_p3, %p3947_p2 }
  0x2e   :  { %p3950_p5 = pnand %p3949_p4, %p3943_p1 }
  0x30   :  { %3953 = shalt.err (!%p3950_p5)
}
  0x31   :  { %s4010_s27 = smov 64   ;;  %s4011_s18 = smov 4  }
  0x32   :  { %85 = dma.hbm_to_vmem [thread:$0]  %s4756_s10, 512, %s80_s28, [#allocation9], %s4010_s27, %s4010_s27, %s4011_s18  }
  0x33   :  { %3994 = dma.done.wait [#allocation3], 64  }
  0x34   :  { %3995 = vsyncadd [#allocation3], 4294967232 }
  0x35   :  { %3996 = dma.done.wait [#allocation6], 32  }
  0x36   :  { %3997 = vsyncadd [#allocation6], 4294967264 }
  0x37   :  { %3998 = dma.done.wait [#allocation9], 512  }
  0x38   :  { %3999 = vsyncadd [#allocation9], 4294966784  ;;  %vm119_vm0 = vcmask 261120   ;;  %s4768_s21 = sld [smem:[#allocation18_spill]]  ;;  %v3730_v28 = vld [vmem:[%s4750_s4 + $0x8] sm:$0xff]   ;;  %v3731_v29 = vld [vmem:[%s4750_s4] sm:$0xff]  }
  0x39   :  { %3440 = vmatprep.subr.bf16.mxu1 %v3730_v28  ;;  %v3216_v44 = vld [vmem:[#allocation5] ss:$0 sm:$0xff]  ;;  %v3217_v49 = vld [vmem:[#allocation7] ss:$0 sm:$0xff]  ;;  %v4012_v62 = vmov 0.0   ;;  %vm4013_vm1 = vmmov 0  }
  0x3a   :  { %3441 = vmatpush3.bf16.msra.mxu1 %v3730_v28  ;;  %3454 = vmatprep.subr.bf16.mxu0 %v4012_v62  ;;  %s4014_s19 = smov 96   ;;  %vm304_vm2 = vcmask 130048   ;;  %vm498_vm3 = vcmask 64512   ;;  %vm552_vm4 = vcmask 1043456   ;;  %s4015_s1 = smov 80   ;;  %vm1557_vm5 = vcmask 523264  }
  0x3b   :  { %3442 = vmatprep.subr.bf16.mxu1 %v3731_v29  ;;  %3456 = vmatprep.mubr.msk.bf16.mxu0 %vm4013_vm1, %v4012_v62  ;;  %s4016_s3 = smov 112   ;;  %s4017_s20 = smov 48  }
  0x3e   :  { %v109_v0 = vld [vmem:[%s4768_s21] sm:$0xff]  ;;  %v111_v1 = vld [vmem:[%s4768_s21 + $0x10] sm:$0xff]  ;;  %v110_v2 = vld [vmem:[%s4768_s21 + $0x8] sm:$0xff]  ;;  %3443 = vmatpush3.bf16.msra.mxu1 %v3731_v29 }
  0x3f   :  { %v120_v3 = vsel %vm119_vm0, %v109_v0, 0.0  ;;  %v126_v4 = vsel %vm119_vm0, %v111_v1, 0.0  ;;  %v112_v5 = vld [vmem:[%s4768_s21 + $0x18] sm:$0xff]  ;;  %v123_v6 = vsel %vm119_vm0, %v110_v2, 0.0  ;;  %3448 = vmatprep.subr.bf16.mxu1 %v4012_v62 }
  0x40   :  { %121 = vadd.xlane.f32.xlu0 %v120_v3  ;;  %127 = vadd.xlane.f32.xlu1 %v126_v4  ;;  %v129_v7 = vsel %vm119_vm0, %v112_v5, 0.0 }
  0x44   :  { %124 = vadd.xlane.f32.xlu0 %v123_v6  ;;  %130 = vadd.xlane.f32.xlu1 %v129_v7 }
  0xc9   :  { %v122_v8 = vpop.xlane.xlu0 %121  ;;  %v128_v9 = vpop.xlane.xlu1 %127 }
  0xca   :  { %v133_v10 = vmul.f32 0.03125, %v122_v8  ;;  %v135_v11 = vmul.f32 0.03125, %v128_v9 }
  0xcc   :  { %v137_v12 = vsub.f32 %v109_v0, %v133_v10  ;;  %v139_v13 = vsub.f32 %v111_v1, %v135_v11  ;;  %v3218_v0 = vld [vmem:[%s4751_s5] ss:$0 sm:$0xff] }
  0xcd   :  { %v125_v14 = vpop.xlane.xlu0 %124  ;;  %v131_v15 = vpop.xlane.xlu1 %130 }
  0xce   :  { %v134_v16 = vmul.f32 0.03125, %v125_v14  ;;  %v136_v17 = vmul.f32 0.03125, %v131_v15  ;;  %v141_v18 = vmul.f32 %v137_v12, %v137_v12  ;;  %v143_v19 = vmul.f32 %v139_v13, %v139_v13 }
  0xd0   :  { %v138_v20 = vsub.f32 %v110_v2, %v134_v16  ;;  %v140_v21 = vsub.f32 %v112_v5, %v136_v17  ;;  %v145_v22 = vsel %vm119_vm0, %v141_v18, 0.0  ;;  %v151_v23 = vsel %vm119_vm0, %v143_v19, 0.0 }
  0xd1   :  { %146 = vadd.xlane.f32.xlu0 %v145_v22 }
  0xd2   :  { %v142_v24 = vmul.f32 %v138_v20, %v138_v20  ;;  %v144_v25 = vmul.f32 %v140_v21, %v140_v21 }
  0xd4   :  { %v148_v26 = vsel %vm119_vm0, %v142_v24, 0.0  ;;  %v154_v27 = vsel %vm119_vm0, %v144_v25, 0.0  ;;  %v4218_v24 = vld [vmem:[#allocation2 + $0x1] ss:$0 sm:$0xff] }
  0xd5   :  { %152 = vadd.xlane.f32.xlu0 %v151_v23  ;;  %149 = vadd.xlane.f32.xlu1 %v148_v26 }
  0xd9   :  { %155 = vadd.xlane.f32.xlu1 %v154_v27 }
 0x15a   :  { %v147_v30 = vpop.xlane.xlu0 %146 }
 0x15b   :  { %v157_v31 = vmul.f32 0.03125, %v147_v30 }
 0x15d   :  { %v161_v32 = vadd.f32 1e-12, %v157_v31  ;;  %v4222_v31 = vld [vmem:[#allocation2 + $0x2] ss:$0 sm:$0xff] }
 0x15e   :  { %v150_v33 = vpop.xlane.xlu1 %149  ;;  %v153_v34 = vpop.xlane.xlu0 %152 }
 0x15f   :  { %3750 = vrsqrt.f32 %v161_v32  ;;  %v158_v35 = vmul.f32 0.03125, %v150_v33  ;;  %v159_v36 = vmul.f32 0.03125, %v153_v34 }
 0x161   :  { %v162_v37 = vadd.f32 1e-12, %v158_v35  ;;  %v163_v38 = vadd.f32 1e-12, %v159_v36 }
 0x162   :  { %v156_v39 = vpop.xlane.xlu1 %155 }
 0x163   :  { %3752 = vrsqrt.f32 %v162_v37  ;;  %v160_v40 = vmul.f32 0.03125, %v156_v39 }
 0x164   :  { %3754 = vrsqrt.f32 %v163_v38  ;;  %v4226_v38 = vld [vmem:[#allocation2 + $0x3] ss:$0 sm:$0xff] }
 0x165   :  { %v164_v41 = vadd.f32 1e-12, %v160_v40 }
 0x167   :  { %3756 = vrsqrt.f32 %v164_v41 }
 0x16c   :  { %v3751_v42 = vpop.eup %3750 }
 0x16d   :  { %v169_v43 = vmul.f32 %v3751_v42, %v137_v12 }
 0x16f   :  { %v179_v48 = vmul.f32 %v3216_v44, %v169_v43 }
 0x170   :  { %v3753_v45 = vpop.eup %3752 }
 0x171   :  { %v3755_v46 = vpop.eup %3754  ;;  %v170_v47 = vmul.f32 %v3753_v45, %v138_v20  ;;  %v4152_v53 = vadd.f32 %v3217_v49, %v179_v48  ;;  %v4215_v20 = vld [vmem:[#allocation2] ss:$0 sm:$0xff] }
 0x172   :  { %v171_v50 = vmul.f32 %v3755_v46, %v139_v13 }
 0x173   :  { %v180_v51 = vmul.f32 %v3216_v44, %v170_v47 }
 0x174   :  { %v3757_v52 = vpop.eup %3756  ;;  %v181_v56 = vmul.f32 %v3216_v44, %v171_v50 }
 0x175   :  { %v4154_v54 = vadd.f32 %v3217_v49, %v180_v51  ;;  %v172_v55 = vmul.f32 %v3757_v52, %v140_v21 }
 0x176   :  { %v4159_v59 = vadd.f32 %v3217_v49, %v181_v56 }
 0x177   :  { %v193_v57 = vpack.c.bf16 %v4154_v54, %v4152_v53  ;;  %v182_v58 = vmul.f32 %v3216_v44, %v172_v55 }
 0x179   :  { %3444 = vmatprep.mubr.msk.bf16.mxu1 %vm119_vm0, %v193_v57  ;;  %v4161_v60 = vadd.f32 %v3217_v49, %v182_v58 }
 0x17b   :  { %v194_v61 = vpack.c.bf16 %v4161_v60, %v4159_v59 }
 0x17d   :  { %3445 = vmatmul.mubr.msk.bf16.vlgmr.msra.gmra.mxu1 %vm119_vm0, %v194_v61 }
 0x17e   :  { %3450 = vmatprep.mubr.msk.bf16.mxu1 %vm4013_vm1, %v4012_v62 }
 0x23d   :  { %v3446_v63 = vpop.f32.mrf.mxu1 }
 0x23e   :  { %v267_v7 = vadd.f32 %v3446_v63, %v3218_v0 }
 0x23f   :  { %v258_v1 = vpop.f32.mrf.mxu1 }
 0x240   :  { %v259_v2 = vadd.f32 %v3218_v0, %v258_v1  ;;  %v4183_v9 = vpack.c.bf16 %v267_v7, %v267_v7 }
 0x241   :  { %v3447_v3 = vpop.f32.mrf.mxu1 }
 0x242   :  { %v4175_v4 = vpack.c.bf16 %v259_v2, %v259_v2  ;;  %v270_v10 = vadd.f32 %v3447_v3, %v3218_v0 }
 0x243   :  { %v261_v5 = vpop.f32.mrf.mxu1 }
 0x244   :  { %v262_v6 = vadd.f32 %v3218_v0, %v261_v5  ;;  %302 = vrot.lane.b32.xlu0 %v4175_v4, %s4014_s19  ;;  %v4187_v11 = vpack.c.bf16 %v270_v10, %v270_v10 }
 0x246   :  { %v4179_v8 = vpack.c.bf16 %v262_v6, %v262_v6 }
 0x248   :  { %352 = vrot.lane.b32.xlu1 %v4179_v8, %s4014_s19 }
 0x24c   :  { %401 = vrot.lane.b32.xlu1 %v4183_v9, %s4014_s19 }
 0x250   :  { %450 = vrot.lane.b32.xlu1 %v4187_v11, %s4014_s19 }
 0x2b6   :  { %v303_v12 = vpop.permute.xlu0 %302 }
 0x2b7   :  { %v309_v13 = vsel %vm304_vm2, %v303_v12, 0 }
 0x2b8   :  { %3449 = vmatpush3.bf16.xpose.msra.mxu1 %v309_v13 }
 0x2b9   :  { %3460 = vmatprep.subr.bf16.mxu1 %v4012_v62 }
 0x2ba   :  { %v353_v14 = vpop.permute.xlu1 %352 }
 0x2bb   :  { %v358_v15 = vsel %vm304_vm2, %v353_v14, 0 }
 0x2bc   :  { %3455 = vmatpush3.bf16.xpose.msra.mxu0 %v358_v15 }
 0x2bd   :  { %3466 = vmatprep.subr.bf16.mxu0 %v4012_v62 }
 0x2be   :  { %v402_v16 = vpop.permute.xlu1 %401 }
 0x2bf   :  { %v407_v17 = vsel %vm304_vm2, %v402_v16, 0  ;;  %3451 = vmatmul.mubr.msk.bf16.vlgmr.msra.gmra.mxu1 %vm304_vm2, %v4175_v4 }
 0x2c0   :  { %3461 = vmatpush3.bf16.xpose.msra.mxu1 %v407_v17  ;;  %3462 = vmatprep.mubr.msk.bf16.mxu1 %vm4013_vm1, %v4012_v62 }
 0x2c1   :  { %3472 = vmatprep.subr.bf16.mxu1 %v4012_v62 }
 0x2c2   :  { %v451_v18 = vpop.permute.xlu1 %450 }
 0x2c3   :  { %v456_v19 = vsel %vm304_vm2, %v451_v18, 0  ;;  %3457 = vmatmul.mubr.msk.bf16.vlgmr.msra.gmra.mxu0 %vm304_vm2, %v4179_v8 }
 0x2c4   :  { %3467 = vmatpush3.bf16.xpose.msra.mxu0 %v456_v19  ;;  %3468 = vmatprep.mubr.msk.bf16.mxu0 %vm4013_vm1, %v4012_v62 }
 0x2c5   :  { %3478 = vmatprep.subr.bf16.mxu0 %v4012_v62 }
 0x2c7   :  { %3463 = vmatmul.mubr.msk.bf16.vlgmr.msra.gmra.mxu1 %vm304_vm2, %v4183_v9 }
 0x2c8   :  { %3474 = vmatprep.mubr.msk.bf16.mxu1 %vm4013_vm1, %v4012_v62 }
 0x2cb   :  { %3469 = vmatmul.mubr.msk.bf16.vlgmr.msra.gmra.mxu0 %vm304_vm2, %v4187_v11 }
 0x2cc   :  { %3480 = vmatprep.mubr.msk.bf16.mxu0 %vm4013_vm1, %v4012_v62 }
 0x37f   :  { %v345_v21 = vpop.f32.mrf.mxu1 }
 0x380   :  { %v346_v22 = vadd.f32 %v4215_v20, %v345_v21 }
 0x381   :  { %v3452_v23 = vpop.f32.mrf.mxu1 }
 0x382   :  { %v499_v25 = vsel %vm498_vm3, %v346_v22, -inf }
 0x383   :  { %v394_v26 = vpop.f32.mrf.mxu0  ;;  %500 = vmax.xlane.f32.xlu0 %v499_v25  ;;  %v348_v27 = vpop.f32.mrf.mxu1 }
 0x384   :  { %v395_v28 = vadd.f32 %v4218_v24, %v394_v26 }
 0x385   :  { %v3453_v29 = vpop.f32.mrf.mxu1  ;;  %v3458_v30 = vpop.f32.mrf.mxu0 }
 0x386   :  { %v502_v32 = vsel %vm498_vm3, %v395_v28, -inf }
 0x387   :  { %503 = vmax.xlane.f32.xlu1 %v502_v32  ;;  %v397_v33 = vpop.f32.mrf.mxu0  ;;  %v443_v34 = vpop.f32.mrf.mxu1 }
 0x388   :  { %v444_v35 = vadd.f32 %v4222_v31, %v443_v34 }
 0x389   :  { %v3459_v36 = vpop.f32.mrf.mxu0  ;;  %v3464_v37 = vpop.f32.mrf.mxu1 }
 0x38a   :  { %v505_v39 = vsel %vm498_vm3, %v444_v35, -inf }
 0x38b   :  { %v492_v40 = vpop.f32.mrf.mxu0  ;;  %506 = vmax.xlane.f32.xlu0 %v505_v39  ;;  %v446_v41 = vpop.f32.mrf.mxu1 }
 0x38c   :  { %v493_v42 = vadd.f32 %v4226_v38, %v492_v40 }
 0x38d   :  { %v3465_v43 = vpop.f32.mrf.mxu1  ;;  %v3470_v44 = vpop.f32.mrf.mxu0 }
 0x38e   :  { %v508_v45 = vsel %vm498_vm3, %v493_v42, -inf }
 0x38f   :  { %v495_v46 = vpop.f32.mrf.mxu0  ;;  %509 = vmax.xlane.f32.xlu0 %v508_v45 }
 0x391   :  { %v3471_v47 = vpop.f32.mrf.mxu0 }
 0x398   :  { %596 = vrot.lane.b32.xlu1 %v4179_v8, %s4010_s27 }
 0x39c   :  { %644 = vrot.lane.b32.xlu1 %v4183_v9, %s4010_s27 }
 0x3a0   :  { %692 = vrot.lane.b32.xlu1 %v4187_v11, %s4010_s27 }
 0x40c   :  { %v501_v48 = vpop.xlane.xlu0 %500 }
 0x40d   :  { %v511_v49 = vsub.f32 %v346_v22, %v501_v48 }
 0x40f   :  { %v515_v50 = vmul.f32 1.442695, %v511_v49 }
 0x410   :  { %v504_v51 = vpop.xlane.xlu1 %503 }
 0x411   :  { %3758 = vpow2.f32 %v515_v50  ;;  %v512_v52 = vsub.f32 %v395_v28, %v504_v51 }
 0x413   :  { %v517_v55 = vmul.f32 1.442695, %v512_v52 }
 0x414   :  { %v597_v56 = vpop.permute.xlu1 %596  ;;  %v507_v1 = vpop.xlane.xlu0 %506 }
 0x415   :  { %3760 = vpow2.f32 %v517_v55  ;;  %v602_v57 = vsel %vm552_vm4, %v597_v56, 0  ;;  %v513_v2 = vsub.f32 %v444_v35, %v507_v1 }
 0x416   :  { %3479 = vmatpush3.bf16.msra.mxu0 %v602_v57 }
 0x417   :  { %3490 = vmatprep.subr.bf16.mxu0 %v4012_v62  ;;  %v519_v5 = vmul.f32 1.442695, %v513_v2 }
 0x418   :  { %v510_v3 = vpop.xlane.xlu0 %509  ;;  %v645_v15 = vpop.permute.xlu1 %644 }
 0x419   :  { %v514_v6 = vsub.f32 %v493_v42, %v510_v3  ;;  %3762 = vpow2.f32 %v519_v5  ;;  %v650_v27 = vsel %vm552_vm4, %v645_v15, 0 }
 0x41b   :  { %v521_v7 = vmul.f32 1.442695, %v514_v6 }
 0x41c   :  { %v693_v16 = vpop.permute.xlu1 %692 }
 0x41d   :  { %3764 = vpow2.f32 %v521_v7  ;;  %v698_v30 = vsel %vm552_vm4, %v693_v16, 0 }
 0x41e   :  { %v3759_v58 = vpop.eup %3758 }
 0x41f   :  { %v523_v61 = vsel %vm498_vm3, %v3759_v58, 0.0 }
 0x420   :  { %524 = vadd.xlane.f32.xlu0 %v523_v61 }
 0x422   :  { %v3761_v63 = vpop.eup %3760 }
 0x423   :  { %v526_v0 = vsel %vm498_vm3, %v3761_v63, 0.0 }
 0x424   :  { %527 = vadd.xlane.f32.xlu1 %v526_v0 }
 0x426   :  { %v3763_v10 = vpop.eup %3762 }
 0x427   :  { %v529_v12 = vsel %vm498_vm3, %v3763_v10, 0.0 }
 0x42a   :  { %v3765_v13 = vpop.eup %3764 }
 0x42b   :  { %v532_v14 = vsel %vm498_vm3, %v3765_v13, 0.0 }
 0x435   :  { %796 = vrot.lane.b32.xlu1 %v4179_v8, %s4015_s1 }
 0x436   :  { %547 = vrot.lane.b32.xlu0 %v4175_v4, %s4010_s27 }
 0x455   :  { %530 = vadd.xlane.f32.xlu0 %v529_v12 }
 0x459   :  { %533 = vadd.xlane.f32.xlu1 %v532_v14 }
 0x46a   :  { %794 = vrot.lane.b32.xlu1 %v4179_v8, %s4016_s3 }
 0x46b   :  { %746 = vrot.lane.b32.xlu0 %v4175_v4, %s4015_s1 }
 0x46e   :  { %896 = vrot.lane.b32.xlu1 %v4187_v11, %s4015_s1 }
 0x46f   :  { %744 = vrot.lane.b32.xlu0 %v4175_v4, %s4016_s3 }
 0x472   :  { %894 = vrot.lane.b32.xlu1 %v4187_v11, %s4016_s3 }
 0x473   :  { %846 = vrot.lane.b32.xlu0 %v4183_v9, %s4015_s1 }
 0x477   :  { %844 = vrot.lane.b32.xlu0 %v4183_v9, %s4016_s3 }
 0x4a9   :  { %v525_v17 = vpop.xlane.xlu0 %524 }
 0x4aa   :  { %3766 = vrcp.f32 %v525_v17 }
 0x4ad   :  { %v528_v18 = vpop.xlane.xlu1 %527  ;;  %v548_v19 = vpop.permute.xlu0 %547 }
 0x4ae   :  { %3768 = vrcp.f32 %v528_v18  ;;  %v554_v21 = vsel %vm552_vm4, %v548_v19, 0 }
 0x4af   :  { %3473 = vmatpush3.bf16.msra.mxu1 %v554_v21 }
 0x4b0   :  { %3484 = vmatprep.subr.bf16.mxu1 %v4012_v62 }
 0x4b1   :  { %v797_v32 = vpop.permute.xlu1 %796 }
 0x4b2   :  { %v802_v46 = vsel %vm304_vm2, %v797_v32, 0 }
 0x4b7   :  { %v3767_v22 = vpop.eup %3766 }
 0x4b8   :  { %v536_v23 = vmul.f32 %v3767_v22, %v3759_v58 }
 0x4ba   :  { %v543_v25 = vpack.c.bf16 %v536_v23, %v536_v23 }
 0x4bb   :  { %v3769_v26 = vpop.eup %3768 }
 0x4bc   :  { %3475 = vmatmul.mubr.msk.bf16.vlgmr.msra.gmra.mxu1 %vm498_vm3, %v543_v25  ;;  %v538_v28 = vmul.f32 %v3769_v26, %v3761_v63 }
 0x4bd   :  { %3485 = vmatpush3.bf16.msra.mxu1 %v650_v27  ;;  %3486 = vmatprep.mubr.msk.bf16.mxu1 %vm4013_vm1, %v4012_v62 }
 0x4be   :  { %v544_v29 = vpack.c.bf16 %v538_v28, %v538_v28  ;;  %3496 = vmatprep.subr.bf16.mxu1 %v4012_v62 }
 0x4c0   :  { %3481 = vmatmul.mubr.msk.bf16.vlgmr.msra.gmra.mxu0 %vm498_vm3, %v544_v29 }
 0x4c1   :  { %3491 = vmatpush3.bf16.msra.mxu0 %v698_v30  ;;  %3492 = vmatprep.mubr.msk.bf16.mxu0 %vm4013_vm1, %v4012_v62 }
 0x4c2   :  { %3502 = vmatprep.subr.bf16.mxu0 %v4012_v62 }
 0x4de   :  { %v531_v33 = vpop.xlane.xlu0 %530 }
 0x4df   :  { %3770 = vrcp.f32 %v531_v33 }
 0x4e2   :  { %v534_v34 = vpop.xlane.xlu1 %533  ;;  %v747_v35 = vpop.permute.xlu0 %746 }
 0x4e3   :  { %3772 = vrcp.f32 %v534_v34  ;;  %v752_v42 = vsel %vm304_vm2, %v747_v35, 0 }
 0x4e6   :  { %v745_v41 = vpop.permute.xlu0 %744  ;;  %v795_v45 = vpop.permute.xlu1 %794 }
 0x4ea   :  { %v847_v47 = vpop.permute.xlu0 %846  ;;  %v897_v49 = vpop.permute.xlu1 %896 }
 0x4eb   :  { %v852_v48 = vsel %vm304_vm2, %v847_v47, 0  ;;  %v902_v50 = vsel %vm304_vm2, %v897_v49, 0 }
 0x4ec   :  { %v3771_v36 = vpop.eup %3770 }
 0x4ed   :  { %v540_v37 = vmul.f32 %v3771_v36, %v3763_v10 }
 0x4ee   :  { %v845_v51 = vpop.permute.xlu0 %844  ;;  %v895_v52 = vpop.permute.xlu1 %894 }
 0x4ef   :  { %v545_v39 = vpack.c.bf16 %v540_v37, %v540_v37 }
 0x4f0   :  { %v3773_v40 = vpop.eup %3772 }
 0x4f1   :  { %3487 = vmatmul.mubr.msk.bf16.vlgmr.msra.gmra.mxu1 %vm498_vm3, %v545_v39  ;;  %v542_v43 = vmul.f32 %v3773_v40, %v3765_v13 }
 0x4f2   :  { %3497 = vmatpush3.bf16.xpose.msra.mxu1 %v752_v42  ;;  %3498 = vmatprep.mubr.msk.bf16.mxu1 %vm4013_vm1, %v4012_v62 }
 0x4f3   :  { %v546_v44 = vpack.c.bf16 %v542_v43, %v542_v43  ;;  %3508 = vmatprep.subr.bf16.mxu1 %v4012_v62 }
 0x4f5   :  { %3493 = vmatmul.mubr.msk.bf16.vlgmr.msra.gmra.mxu0 %vm498_vm3, %v546_v44 }
 0x4f6   :  { %3503 = vmatpush3.bf16.xpose.msra.mxu0 %v802_v46  ;;  %3504 = vmatprep.mubr.msk.bf16.mxu0 %vm4013_vm1, %v4012_v62 }
 0x4f7   :  { %3514 = vmatprep.subr.bf16.mxu0 %v4012_v62 }
 0x4f9   :  { %3499 = vmatmul.mubr.msk.bf16.vlgmr.msra.gmra.mxu1 %vm304_vm2, %v745_v41 }
 0x4fa   :  { %3509 = vmatpush3.bf16.xpose.msra.mxu1 %v852_v48  ;;  %3510 = vmatprep.mubr.msk.bf16.mxu1 %vm4013_vm1, %v4012_v62 }
 0x4fb   :  { %3520 = vmatprep.subr.bf16.mxu1 %v4012_v62 }
 0x4fd   :  { %3505 = vmatmul.mubr.msk.bf16.vlgmr.msra.gmra.mxu0 %vm304_vm2, %v795_v45 }
 0x4fe   :  { %3515 = vmatpush3.bf16.xpose.msra.mxu0 %v902_v50  ;;  %3516 = vmatprep.mubr.msk.bf16.mxu0 %vm4013_vm1, %v4012_v62 }
 0x4ff   :  { %3526 = vmatprep.subr.bf16.mxu0 %v4012_v62 }
 0x501   :  { %3511 = vmatmul.mubr.msk.bf16.vlgmr.msra.gmra.mxu1 %vm304_vm2, %v845_v51 }
 0x502   :  { %3522 = vmatprep.mubr.msk.bf16.mxu1 %vm4013_vm1, %v4012_v62 }
 0x505   :  { %3517 = vmatmul.mubr.msk.bf16.vlgmr.msra.gmra.mxu0 %vm304_vm2, %v895_v52 }
 0x506   :  { %3528 = vmatprep.mubr.msk.bf16.mxu0 %vm4013_vm1, %v4012_v62 }
 0x57c   :  { %v4299_v55 = vpop.f32.mrf.mxu1 }
 0x57e   :  { %v3476_v56 = vpop.f32.mrf.mxu1 }
 0x580   :  { %v593_v57 = vpop.f32.mrf.mxu1  ;;  %v4301_v58 = vpop.f32.mrf.mxu0 }
 0x581   :  { %v740_v61 = vpack.c.bf16 %v4301_v58, %v4299_v55 }
 0x582   :  { %v3477_v63 = vpop.f32.mrf.mxu1  ;;  %v3482_v0 = vpop.f32.mrf.mxu0 }
 0x584   :  { %v641_v1 = vpop.f32.mrf.mxu0 }
 0x586   :  { %v3483_v2 = vpop.f32.mrf.mxu0 }
 0x5b1   :  { %v4305_v3 = vpop.f32.mrf.mxu1 }
 0x5b3   :  { %v3488_v5 = vpop.f32.mrf.mxu1 }
 0x5b5   :  { %v689_v6 = vpop.f32.mrf.mxu1  ;;  %v4307_v7 = vpop.f32.mrf.mxu0 }
 0x5b6   :  { %v741_v10 = vpack.c.bf16 %v4307_v7, %v4305_v3 }
 0x5b7   :  { %v3489_v12 = vpop.f32.mrf.mxu1  ;;  %v3494_v13 = vpop.f32.mrf.mxu0 }
 0x5b9   :  { %v737_v14 = vpop.f32.mrf.mxu0  ;;  %v788_v15 = vpop.f32.mrf.mxu1 }
 0x5ba   :  { %v789_v16 = vadd.f32 %v4215_v20, %v788_v15 }
 0x5bb   :  { %v3495_v17 = vpop.f32.mrf.mxu0  ;;  %v3500_v18 = vpop.f32.mrf.mxu1 }
 0x5bc   :  { %v944_v19 = vsel %vm498_vm3, %v789_v16, -inf }
 0x5bd   :  { %v838_v21 = vpop.f32.mrf.mxu0  ;;  %945 = vmax.xlane.f32.xlu0 %v944_v19  ;;  %v791_v22 = vpop.f32.mrf.mxu1 }
 0x5be   :  { %v839_v23 = vadd.f32 %v4218_v24, %v838_v21 }
 0x5bf   :  { %v3501_v25 = vpop.f32.mrf.mxu1  ;;  %v3506_v26 = vpop.f32.mrf.mxu0 }
 0x5c0   :  { %v947_v27 = vsel %vm498_vm3, %v839_v23, -inf }
 0x5c1   :  { %948 = vmax.xlane.f32.xlu1 %v947_v27  ;;  %v841_v28 = vpop.f32.mrf.mxu0  ;;  %v888_v29 = vpop.f32.mrf.mxu1 }
 0x5c2   :  { %v889_v30 = vadd.f32 %v4222_v31, %v888_v29  ;;  %v3732_v28 = vld [vmem:[%s4752_s6] sm:$0xff]  }
 0x5c3   :  { %v3507_v32 = vpop.f32.mrf.mxu0  ;;  %v3512_v20 = vpop.f32.mrf.mxu1 }
 0x5c4   :  { %v950_v33 = vsel %vm498_vm3, %v889_v30, -inf }
 0x5c5   :  { %v938_v34 = vpop.f32.mrf.mxu0  ;;  %951 = vmax.xlane.f32.xlu0 %v950_v33  ;;  %v891_v35 = vpop.f32.mrf.mxu1 }
 0x5c6   :  { %v939_v36 = vadd.f32 %v4226_v38, %v938_v34  ;;  %v3733_v34 = vld [vmem:[%s4752_s6 + $0x8] sm:$0xff]  }
 0x5c7   :  { %v3513_v37 = vpop.f32.mrf.mxu1  ;;  %v3518_v24 = vpop.f32.mrf.mxu0 }
 0x5c8   :  { %v953_v39 = vsel %vm498_vm3, %v939_v36, -inf }
 0x5c9   :  { %v941_v40 = vpop.f32.mrf.mxu0  ;;  %954 = vmax.xlane.f32.xlu0 %v953_v39 }
 0x5cb   :  { %v3519_v41 = vpop.f32.mrf.mxu0 }
 0x646   :  { %v946_v42 = vpop.xlane.xlu0 %945 }
 0x647   :  { %v956_v43 = vsub.f32 %v789_v16, %v946_v42 }
 0x649   :  { %v960_v44 = vmul.f32 1.442695, %v956_v43 }
 0x64a   :  { %v949_v31 = vpop.xlane.xlu1 %948 }
 0x64b   :  { %3774 = vpow2.f32 %v960_v44  ;;  %v957_v45 = vsub.f32 %v839_v23, %v949_v31 }
 0x64d   :  { %v962_v46 = vmul.f32 1.442695, %v957_v45 }
 0x64e   :  { %v952_v47 = vpop.xlane.xlu0 %951 }
 0x64f   :  { %3776 = vpow2.f32 %v962_v46  ;;  %v958_v48 = vsub.f32 %v889_v30, %v952_v47 }
 0x651   :  { %v964_v49 = vmul.f32 1.442695, %v958_v48 }
 0x652   :  { %v955_v63 = vpop.xlane.xlu0 %954 }
 0x653   :  { %3778 = vpow2.f32 %v964_v49  ;;  %v959_v0 = vsub.f32 %v939_v36, %v955_v63 }
 0x655   :  { %v966_v1 = vmul.f32 1.442695, %v959_v0 }
 0x657   :  { %3780 = vpow2.f32 %v966_v1 }
 0x658   :  { %v3775_v38 = vpop.eup %3774 }
 0x659   :  { %v968_v50 = vsel %vm498_vm3, %v3775_v38, 0.0 }
 0x65a   :  { %969 = vadd.xlane.f32.xlu0 %v968_v50  ;;  %v3251_v50 = vld [vmem:[%s4753_s7] ss:$0 sm:$0xff] }
 0x65c   :  { %v3777_v51 = vpop.eup %3776 }
 0x65d   :  { %v971_v52 = vsel %vm498_vm3, %v3777_v51, 0.0 }
 0x65e   :  { %972 = vadd.xlane.f32.xlu1 %v971_v52 }
 0x660   :  { %v3779_v56 = vpop.eup %3778 }
 0x661   :  { %v974_v57 = vsel %vm498_vm3, %v3779_v56, 0.0 }
 0x662   :  { %975 = vadd.xlane.f32.xlu0 %v974_v57 }
 0x664   :  { %v3781_v2 = vpop.eup %3780 }
 0x665   :  { %v977_v5 = vsel %vm498_vm3, %v3781_v2, 0.0 }
 0x66f   :  { %1040 = vrot.lane.b32.xlu1 %v4179_v8, %s4017_s20 }
 0x673   :  { %1088 = vrot.lane.b32.xlu1 %v4183_v9, %s4017_s20 }
 0x678   :  { %992 = vrot.lane.b32.xlu0 %v4175_v4, %s4017_s20 }
 0x697   :  { %978 = vadd.xlane.f32.xlu1 %v977_v5 }
 0x6a8   :  { %1136 = vrot.lane.b32.xlu1 %v4187_v11, %s4017_s20 }
 0x6e3   :  { %v970_v6 = vpop.xlane.xlu0 %969 }
 0x6e4   :  { %3782 = vrcp.f32 %v970_v6 }
 0x6e7   :  { %v973_v8 = vpop.xlane.xlu1 %972 }
 0x6e8   :  { %3784 = vrcp.f32 %v973_v8 }
 0x6eb   :  { %v1041_v12 = vpop.permute.xlu1 %1040  ;;  %v976_v9 = vpop.xlane.xlu0 %975 }
 0x6ec   :  { %v1046_v13 = vsel %vm552_vm4, %v1041_v12, 0  ;;  %3786 = vrcp.f32 %v976_v9 }
 0x6ed   :  { %3527 = vmatpush3.bf16.msra.mxu0 %v1046_v13 }
 0x6ee   :  { %3538 = vmatprep.subr.bf16.mxu0 %v4012_v62 }
 0x6ef   :  { %v993_v4 = vpop.permute.xlu0 %992  ;;  %v1089_v16 = vpop.permute.xlu1 %1088 }
 0x6f0   :  { %v998_v14 = vsel %vm552_vm4, %v993_v4, 0  ;;  %v1094_v19 = vsel %vm552_vm4, %v1089_v16, 0 }
 0x6f1   :  { %v3783_v15 = vpop.eup %3782  ;;  %3521 = vmatpush3.bf16.msra.mxu1 %v998_v14 }
 0x6f2   :  { %3532 = vmatprep.subr.bf16.mxu1 %v4012_v62  ;;  %v981_v11 = vmul.f32 %v3783_v15, %v3775_v38 }
 0x6f4   :  { %v988_v17 = vpack.c.bf16 %v981_v11, %v981_v11 }
 0x6f5   :  { %v3785_v18 = vpop.eup %3784 }
 0x6f6   :  { %3523 = vmatmul.mubr.msk.bf16.vlgmr.msra.gmra.mxu1 %vm498_vm3, %v988_v17  ;;  %v983_v21 = vmul.f32 %v3785_v18, %v3777_v51 }
 0x6f7   :  { %3533 = vmatpush3.bf16.msra.mxu1 %v1094_v19  ;;  %3534 = vmatprep.mubr.msk.bf16.mxu1 %vm4013_vm1, %v4012_v62 }
 0x6f8   :  { %v989_v22 = vpack.c.bf16 %v983_v21, %v983_v21  ;;  %3544 = vmatprep.subr.bf16.mxu1 %v3733_v34 }
 0x6f9   :  { %v3787_v23 = vpop.eup %3786 }
 0x6fa   :  { %3529 = vmatmul.mubr.msk.bf16.vlgmr.msra.gmra.mxu0 %vm498_vm3, %v989_v22  ;;  %v985_v25 = vmul.f32 %v3787_v23, %v3779_v56 }
 0x6fb   :  { %3540 = vmatprep.mubr.msk.bf16.mxu0 %vm4013_vm1, %v4012_v62 }
 0x6fc   :  { %v990_v26 = vpack.c.bf16 %v985_v25, %v985_v25 }
 0x6fe   :  { %3535 = vmatmul.mubr.msk.bf16.vlgmr.msra.gmra.mxu1 %vm498_vm3, %v990_v26 }
 0x6ff   :  { %3545 = vmatpush3.bf16.msra.mxu1 %v3733_v34 }
 0x720   :  { %v979_v27 = vpop.xlane.xlu1 %978 }
 0x721   :  { %3788 = vrcp.f32 %v979_v27 }
 0x724   :  { %v1137_v29 = vpop.permute.xlu1 %1136 }
 0x725   :  { %v1142_v30 = vsel %vm552_vm4, %v1137_v29, 0 }
 0x726   :  { %3539 = vmatpush3.bf16.msra.mxu0 %v1142_v30 }
 0x727   :  { %3550 = vmatprep.subr.bf16.mxu0 %v3732_v28 }
 0x72e   :  { %v3789_v32 = vpop.eup %3788 }
 0x72f   :  { %v987_v20 = vmul.f32 %v3789_v32, %v3781_v2 }
 0x731   :  { %v991_v33 = vpack.c.bf16 %v987_v20, %v987_v20 }
 0x733   :  { %3541 = vmatmul.mubr.msk.bf16.vlgmr.msra.gmra.mxu0 %vm498_vm3, %v991_v33 }
 0x734   :  { %3552 = vmatprep.mubr.msk.bf16.mxu0 %vm304_vm2, %v740_v61  ;;  %3551 = vmatpush3.bf16.msra.mxu0 %v3732_v28 }
 0x73b   :  { %3553 = vmatmul.mubr.msk.bf16.vlgmr.msra.gmra.mxu0 %vm304_vm2, %v741_v10 }
 0x7b6   :  { %v1034_v35 = vpop.f32.mrf.mxu1 }
 0x7b8   :  { %v3524_v36 = vpop.f32.mrf.mxu1 }
 0x7b9   :  { %v3735_v36 = vld [vmem:[#allocation8] sm:$0xff]  }
 0x7ba   :  { %v1037_v37 = vpop.f32.mrf.mxu1  ;;  %v1082_v24 = vpop.f32.mrf.mxu0 }
 0x7bb   :  { %v1184_v39 = vpack.c.bf16 %v1082_v24, %v1034_v35  ;;  %v3734_v35 = vld [vmem:[#allocation8 + $0x8] sm:$0xff]  }
 0x7bc   :  { %v3525_v55 = vpop.f32.mrf.mxu1  ;;  %v3530_v58 = vpop.f32.mrf.mxu0  ;;  %3556 = vmatprep.subr.bf16.mxu1 %v3734_v35 }
 0x7bd   :  { %3546 = vmatprep.mubr.msk.bf16.mxu1 %vm304_vm2, %v1184_v39 }
 0x7be   :  { %v1085_v61 = vpop.f32.mrf.mxu0  ;;  %v1130_v40 = vpop.f32.mrf.mxu1 }
 0x7c0   :  { %v3531_v3 = vpop.f32.mrf.mxu0  ;;  %v3536_v7 = vpop.f32.mrf.mxu1 }
 0x7c2   :  { %v1133_v10 = vpop.f32.mrf.mxu1 }
 0x7c4   :  { %v3537_v41 = vpop.f32.mrf.mxu1 }
 0x7f3   :  { %v1178_v42 = vpop.f32.mrf.mxu0 }
 0x7f4   :  { %v1185_v43 = vpack.c.bf16 %v1178_v42, %v1130_v40 }
 0x7f5   :  { %v3542_v44 = vpop.f32.mrf.mxu0 }
 0x7f6   :  { %3547 = vmatmul.mubr.msk.bf16.vlgmr.msra.gmra.mxu1 %vm304_vm2, %v1185_v43 }
 0x7f7   :  { %v1181_v31 = vpop.f32.mrf.mxu0  ;;  %3557 = vmatpush3.bf16.msra.mxu1 %v3734_v35 }
 0x7f8   :  { %3558 = vmatprep.subr.bf16.mxu1 %v3735_v36  ;;  %v3252_v31 = vld [vmem:[%s4754_s8] ss:$0 sm:$0xff] }
 0x7f9   :  { %v3543_v45 = vpop.f32.mrf.mxu0 }
 0x7fb   :  { %v3554_v46 = vpop.f32.mrf.mxu0  ;;  %3559 = vmatpush3.bf16.msra.mxu1 %v3735_v36 }
 0x7fd   :  { %v1296_v47 = vpop.f32.mrf.mxu0 }
 0x7ff   :  { %v3555_v38 = vpop.f32.mrf.mxu0 }
 0x801   :  { %v1299_v1 = vpop.f32.mrf.mxu0 }
 0x8b6   :  { %v3548_v48 = vpop.f32.mrf.mxu1 }
 0x8b7   :  { %v1305_v49 = vadd.f32 %v3554_v46, %v3548_v48 }
 0x8b8   :  { %v1235_v51 = vpop.f32.mrf.mxu1 }
 0x8b9   :  { %v1297_v52 = vadd.f32 %v1296_v47, %v1235_v51  ;;  %v1320_v57 = vadd.f32 %v3251_v50, %v1305_v49 }
 0x8ba   :  { %v3549_v56 = vpop.f32.mrf.mxu1 }
 0x8bb   :  { %v1318_v63 = vadd.f32 %v3251_v50, %v1297_v52  ;;  %v1308_v0 = vadd.f32 %v3555_v38, %v3549_v56  ;;  %v1324_v13 = vadd.f32 %v1320_v57, %v4159_v59  ;;  %v3253_v38 = vld [vmem:[%s4755_s9] ss:$0 sm:$0xff] }
 0x8bc   :  { %v1238_v2 = vpop.f32.mrf.mxu1 }
 0x8bd   :  { %v1300_v5 = vadd.f32 %v1299_v1, %v1238_v2  ;;  %v1322_v6 = vadd.f32 %v1318_v63, %v4152_v53  ;;  %v1321_v8 = vadd.f32 %v3251_v50, %v1308_v0  ;;  %v1334_v14 = vsel %vm119_vm0, %v1324_v13, 0.0 }
 0x8bf   :  { %v1319_v12 = vadd.f32 %v3251_v50, %v1300_v5  ;;  %v1328_v9 = vsel %vm119_vm0, %v1322_v6, 0.0  ;;  %v1325_v11 = vadd.f32 %v1321_v8, %v4161_v60  ;;  %v3736_v8 = vld [vmem:[%s4758_s12 + $0x18] sm:$0xff]  }
 0x8c0   :  { %1329 = vadd.xlane.f32.xlu0 %v1328_v9  ;;  %3564 = vmatprep.subr.bf16.mxu0 %v3736_v8  ;;  %v3738_v9 = vld [vmem:[%s4758_s12 + $0x8] sm:$0xff]  }
 0x8c1   :  { %v1323_v4 = vadd.f32 %v1319_v12, %v4154_v54  ;;  %v1337_v16 = vsel %vm119_vm0, %v1325_v11, 0.0  ;;  %v3737_v12 = vld [vmem:[%s4758_s12 + $0x10] sm:$0xff]   ;;  %3565 = vmatpush3.bf16.msra.mxu0 %v3736_v8 }
 0x8c2   :  { %3566 = vmatprep.subr.bf16.mxu0 %v3737_v12 }
 0x8c3   :  { %v1331_v15 = vsel %vm119_vm0, %v1323_v4, 0.0 }
 0x8c4   :  { %1335 = vadd.xlane.f32.xlu0 %v1334_v14  ;;  %1332 = vadd.xlane.f32.xlu1 %v1331_v15 }
 0x8c5   :  { %3567 = vmatpush3.bf16.msra.mxu0 %v3737_v12 }
 0x8c6   :  { %3568 = vmatprep.subr.bf16.mxu0 %v3738_v9 }
 0x8c8   :  { %1338 = vadd.xlane.f32.xlu0 %v1337_v16 }
 0x8c9   :  { %3569 = vmatpush3.bf16.msra.mxu0 %v3738_v9 }
 0x949   :  { %v1330_v53 = vpop.xlane.xlu0 %1329 }
 0x94a   :  { %v1340_v17 = vmul.f32 0.03125, %v1330_v53 }
 0x94c   :  { %v1344_v18 = vsub.f32 %v1322_v6, %v1340_v17 }
 0x94d   :  { %v1336_v19 = vpop.xlane.xlu0 %1335  ;;  %v1333_v21 = vpop.xlane.xlu1 %1332 }
 0x94e   :  { %v1342_v59 = vmul.f32 0.03125, %v1336_v19  ;;  %v1341_v22 = vmul.f32 0.03125, %v1333_v21  ;;  %v1348_v23 = vmul.f32 %v1344_v18, %v1344_v18 }
 0x950   :  { %v1346_v54 = vsub.f32 %v1324_v13, %v1342_v59  ;;  %v1345_v25 = vsub.f32 %v1323_v4, %v1341_v22  ;;  %v1352_v26 = vsel %vm119_vm0, %v1348_v23, 0.0  ;;  %v3739_v13 = vld [vmem:[%s4758_s12] sm:$0xff]  }
 0x951   :  { %1353 = vadd.xlane.f32.xlu0 %v1352_v26  ;;  %v1339_v27 = vpop.xlane.xlu0 %1338  ;;  %3570 = vmatprep.subr.bf16.mxu0 %v3739_v13  ;;  %v3254_v4 = vld [vmem:[%s4757_s11] ss:$0 sm:$0xff] }
 0x952   :  { %v1343_v60 = vmul.f32 0.03125, %v1339_v27  ;;  %v1350_v28 = vmul.f32 %v1346_v54, %v1346_v54  ;;  %v1349_v29 = vmul.f32 %v1345_v25, %v1345_v25  ;;  %3571 = vmatpush3.bf16.msra.mxu0 %v3739_v13 }
 0x953   :  { %3590 = vmatprep.subr.bf16.mxu0 %v4012_v62 }
 0x954   :  { %v1347_v30 = vsub.f32 %v1325_v11, %v1343_v60  ;;  %v1358_v32 = vsel %vm119_vm0, %v1350_v28, 0.0  ;;  %v1355_v20 = vsel %vm119_vm0, %v1349_v29, 0.0 }
 0x955   :  { %1359 = vadd.xlane.f32.xlu0 %v1358_v32  ;;  %1356 = vadd.xlane.f32.xlu1 %v1355_v20 }
 0x956   :  { %v1351_v33 = vmul.f32 %v1347_v30, %v1347_v30 }
 0x958   :  { %v1361_v34 = vsel %vm119_vm0, %v1351_v33, 0.0 }
 0x959   :  { %1362 = vadd.xlane.f32.xlu1 %v1361_v34 }
 0x9da   :  { %v1354_v37 = vpop.xlane.xlu0 %1353 }
 0x9db   :  { %v1364_v24 = vmul.f32 0.03125, %v1354_v37 }
 0x9dd   :  { %v1368_v39 = vadd.f32 1e-12, %v1364_v24 }
 0x9de   :  { %v1360_v55 = vpop.xlane.xlu0 %1359  ;;  %v1357_v58 = vpop.xlane.xlu1 %1356 }
 0x9df   :  { %3790 = vrsqrt.f32 %v1368_v39  ;;  %v1366_v61 = vmul.f32 0.03125, %v1360_v55  ;;  %v1365_v40 = vmul.f32 0.03125, %v1357_v58 }
 0x9e1   :  { %v1370_v3 = vadd.f32 1e-12, %v1366_v61  ;;  %v1369_v7 = vadd.f32 1e-12, %v1365_v40 }
 0x9e2   :  { %v1363_v10 = vpop.xlane.xlu1 %1362 }
 0x9e3   :  { %3792 = vrsqrt.f32 %v1370_v3  ;;  %v1367_v41 = vmul.f32 0.03125, %v1363_v10 }
 0x9e4   :  { %3794 = vrsqrt.f32 %v1369_v7 }
 0x9e5   :  { %v1371_v42 = vadd.f32 1e-12, %v1367_v41 }
 0x9e7   :  { %3796 = vrsqrt.f32 %v1371_v42 }
 0x9ec   :  { %v3791_v43 = vpop.eup %3790 }
 0x9ed   :  { %v1376_v44 = vmul.f32 %v3791_v43, %v1344_v18 }
 0x9ef   :  { %v1386_v49 = vmul.f32 %v3252_v31, %v1376_v44 }
 0x9f0   :  { %v3793_v45 = vpop.eup %3792 }
 0x9f1   :  { %v3795_v46 = vpop.eup %3794  ;;  %v1378_v47 = vmul.f32 %v3793_v45, %v1346_v54  ;;  %v4382_v57 = vadd.f32 %v3253_v38, %v1386_v49 }
 0x9f2   :  { %v1377_v48 = vmul.f32 %v3795_v46, %v1345_v25 }
 0x9f3   :  { %v1388_v56 = vmul.f32 %v3252_v31, %v1378_v47 }
 0x9f4   :  { %v3797_v50 = vpop.eup %3796  ;;  %v1387_v51 = vmul.f32 %v3252_v31, %v1377_v48 }
 0x9f5   :  { %v1379_v52 = vmul.f32 %v3797_v50, %v1347_v30  ;;  %v4388_v2 = vadd.f32 %v3253_v38, %v1388_v56  ;;  %v3259_v50 = vld [vmem:[%s4759_s13] ss:$0 sm:$0xff] }
 0x9f6   :  { %v4384_v63 = vadd.f32 %v3253_v38, %v1387_v51 }
 0x9f7   :  { %v1389_v0 = vmul.f32 %v3252_v31, %v1379_v52 }
 0x9f8   :  { %v1400_v1 = vpack.c.bf16 %v4384_v63, %v4382_v57 }
 0x9f9   :  { %v4390_v5 = vadd.f32 %v3253_v38, %v1389_v0 }
 0x9fa   :  { %3560 = vmatprep.mubr.msk.bf16.mxu1 %vm119_vm0, %v1400_v1 }
 0x9fb   :  { %v1401_v6 = vpack.c.bf16 %v4390_v5, %v4388_v2 }
 0x9fd   :  { %3561 = vmatmul.mubr.msk.bf16.vlgmr.msra.gmra.mxu1 %vm119_vm0, %v1401_v6 }
 0xabd   :  { %v3562_v14 = vpop.f32.mrf.mxu1 }
 0xabe   :  { %v1474_v15 = vadd.f32 %v3562_v14, %v3254_v4 }
 0xabf   :  { %v1465_v11 = vpop.f32.mrf.mxu1 }
 0xac0   :  { %v1486_v16 = vmul.f32 0.044715, %v1474_v15  ;;  %v1466_v53 = vadd.f32 %v3254_v4, %v1465_v11  ;;  %v1482_v44 = vmul.f32 0.5, %v1474_v15 }
 0xac1   :  { %v3563_v17 = vpop.f32.mrf.mxu1 }
 0xac2   :  { %v1490_v18 = vmul.f32 %v1486_v16, %v1474_v15  ;;  %v1484_v19 = vmul.f32 0.044715, %v1466_v53  ;;  %v1477_v21 = vadd.f32 %v3563_v17, %v3254_v4  ;;  %v1480_v41 = vmul.f32 0.5, %v1466_v53 }
 0xac3   :  { %v1468_v59 = vpop.f32.mrf.mxu1 }
 0xac4   :  { %v1494_v22 = vmul.f32 %v1490_v18, %v1474_v15  ;;  %v1488_v23 = vmul.f32 %v1484_v19, %v1466_v53  ;;  %v1487_v54 = vmul.f32 0.044715, %v1477_v21  ;;  %v1469_v25 = vadd.f32 %v3254_v4, %v1468_v59 }
 0xac5   :  { %v1483_v7 = vmul.f32 0.5, %v1477_v21 }
 0xac6   :  { %v1498_v26 = vadd.f32 %v1494_v22, %v1474_v15  ;;  %v1492_v27 = vmul.f32 %v1488_v23, %v1466_v53  ;;  %v1491_v60 = vmul.f32 %v1487_v54, %v1477_v21  ;;  %v1485_v28 = vmul.f32 0.044715, %v1469_v25 }
 0xac7   :  { %v1481_v42 = vmul.f32 0.5, %v1469_v25 }
 0xac8   :  { %v1502_v29 = vmul.f32 0.7978846, %v1498_v26  ;;  %v1496_v30 = vadd.f32 %v1492_v27, %v1466_v53  ;;  %v1495_v32 = vmul.f32 %v1491_v60, %v1477_v21  ;;  %v1489_v20 = vmul.f32 %v1485_v28, %v1469_v25 }
 0xaca   :  { %v1500_v33 = vmul.f32 0.7978846, %v1496_v30  ;;  %v1499_v34 = vadd.f32 %v1495_v32, %v1477_v21  ;;  %v1493_v35 = vmul.f32 %v1489_v20, %v1469_v25  ;;  %3798 = vtanh.f32 %v1502_v29  ;;  %v3740_v32 = vld [vmem:[%s4750_s4 + $0x18] sm:$0xff]   ;;  %v3741_v20 = vld [vmem:[%s4750_s4 + $0x10] sm:$0xff]  }
 0xacb   :  { %3576 = vmatprep.subr.bf16.mxu1 %v3740_v32 }
 0xacc   :  { %v1503_v36 = vmul.f32 0.7978846, %v1499_v34  ;;  %3800 = vtanh.f32 %v1500_v33  ;;  %v1497_v37 = vadd.f32 %v1493_v35, %v1469_v25  ;;  %3577 = vmatpush3.bf16.msra.mxu1 %v3740_v32 }
 0xacd   :  { %3578 = vmatprep.subr.bf16.mxu1 %v3741_v20 }
 0xace   :  { %3802 = vtanh.f32 %v1503_v36  ;;  %v1501_v24 = vmul.f32 0.7978846, %v1497_v37 }
 0xad0   :  { %3804 = vtanh.f32 %v1501_v24  ;;  %3579 = vmatpush3.bf16.msra.mxu1 %v3741_v20 }
 0xad1   :  { %3584 = vmatprep.subr.bf16.mxu1 %v4012_v62 }
 0xad7   :  { %v3799_v39 = vpop.eup %3798 }
 0xad8   :  { %v1510_v10 = vadd.f32 1.0, %v3799_v39 }
 0xad9   :  { %v3801_v55 = vpop.eup %3800 }
 0xada   :  { %v1508_v40 = vadd.f32 1.0, %v3801_v55  ;;  %v1514_v47 = vmul.f32 %v1510_v10, %v1482_v44  ;;  %v3266_v10 = vld [vmem:[%s4760_s14] ss:$0 sm:$0xff] }
 0xadb   :  { %v3803_v58 = vpop.eup %3802 }
 0xadc   :  { %v1511_v61 = vadd.f32 1.0, %v3803_v58  ;;  %v1512_v45 = vmul.f32 %v1508_v40, %v1480_v41 }
 0xadd   :  { %v3805_v3 = vpop.eup %3804 }
 0xade   :  { %v1509_v43 = vadd.f32 1.0, %v3805_v3  ;;  %v1515_v31 = vmul.f32 %v1511_v61, %v1483_v7 }
 0xae0   :  { %v1513_v46 = vmul.f32 %v1509_v43, %v1481_v42  ;;  %v1517_v49 = vpack.c.bf16 %v1515_v31, %v1514_v47  ;;  %v3267_v42 = vld [vmem:[%s4761_s15] ss:$0 sm:$0xff] }
 0xae2   :  { %v1516_v48 = vpack.c.bf16 %v1513_v46, %v1512_v45 }
 0xae4   :  { %3572 = vmatprep.mubr.msk.bf16.mxu0 %vm1557_vm5, %v1516_v48 }
 0xae5   :  { %3573 = vmatmul.mubr.msk.bf16.vlgmr.msra.gmra.mxu0 %vm1557_vm5, %v1517_v49 }
 0xae6   :  { %3592 = vmatprep.mubr.msk.bf16.mxu0 %vm4013_vm1, %v4012_v62 }
 0xba5   :  { %v3574_v38 = vpop.f32.mrf.mxu0 }
 0xba6   :  { %v1607_v52 = vadd.f32 %v3574_v38, %v3259_v50 }
 0xba7   :  { %v1598_v51 = vpop.f32.mrf.mxu0 }
 0xba8   :  { %v1599_v56 = vadd.f32 %v3259_v50, %v1598_v51  ;;  %v1615_v13 = vadd.f32 %v1607_v52, %v4388_v2 }
 0xba9   :  { %v3575_v0 = vpop.f32.mrf.mxu0 }
 0xbaa   :  { %v1613_v1 = vadd.f32 %v1599_v56, %v4382_v57  ;;  %v1610_v8 = vadd.f32 %v3575_v0, %v3259_v50  ;;  %v1625_v15 = vsel %vm119_vm0, %v1615_v13, 0.0 }
 0xbab   :  { %v1601_v6 = vpop.f32.mrf.mxu0 }
 0xbac   :  { %v1602_v12 = vadd.f32 %v3259_v50, %v1601_v6  ;;  %v1619_v9 = vsel %vm119_vm0, %v1613_v1, 0.0  ;;  %v1616_v11 = vadd.f32 %v1610_v8, %v4390_v5 }
 0xbad   :  { %1620 = vadd.xlane.f32.xlu0 %v1619_v9 }
 0xbae   :  { %v1614_v4 = vadd.f32 %v1602_v12, %v4384_v63  ;;  %v1628_v57 = vsel %vm119_vm0, %v1616_v11, 0.0  ;;  %v3273_v12 = vld [vmem:[%s4751_s5 + $0x1] ss:$0 sm:$0xff] }
 0xbb0   :  { %v1622_v14 = vsel %vm119_vm0, %v1614_v4, 0.0 }
 0xbb1   :  { %1623 = vadd.xlane.f32.xlu1 %v1622_v14  ;;  %1626 = vadd.xlane.f32.xlu0 %v1625_v15 }
 0xbb5   :  { %1629 = vadd.xlane.f32.xlu1 %v1628_v57 }
 0xc36   :  { %v1621_v16 = vpop.xlane.xlu0 %1620 }
 0xc37   :  { %v1631_v53 = vmul.f32 0.03125, %v1621_v16 }
 0xc39   :  { %v1635_v17 = vsub.f32 %v1613_v1, %v1631_v53 }
 0xc3a   :  { %v1624_v18 = vpop.xlane.xlu1 %1623  ;;  %v1627_v19 = vpop.xlane.xlu0 %1626 }
 0xc3b   :  { %v1632_v2 = vmul.f32 0.03125, %v1624_v18  ;;  %v1633_v21 = vmul.f32 0.03125, %v1627_v19  ;;  %v1639_v59 = vmul.f32 %v1635_v17, %v1635_v17 }
 0xc3d   :  { %v1636_v63 = vsub.f32 %v1614_v4, %v1632_v2  ;;  %v1637_v22 = vsub.f32 %v1615_v13, %v1633_v21  ;;  %v1643_v23 = vsel %vm119_vm0, %v1639_v59, 0.0 }
 0xc3e   :  { %v1630_v54 = vpop.xlane.xlu1 %1629  ;;  %1644 = vadd.xlane.f32.xlu0 %v1643_v23 }
 0xc3f   :  { %v1634_v5 = vmul.f32 0.03125, %v1630_v54  ;;  %v1640_v25 = vmul.f32 %v1636_v63, %v1636_v63  ;;  %v1641_v26 = vmul.f32 %v1637_v22, %v1637_v22 }
 0xc41   :  { %v1638_v27 = vsub.f32 %v1616_v11, %v1634_v5  ;;  %v1646_v60 = vsel %vm119_vm0, %v1640_v25, 0.0  ;;  %v1649_v28 = vsel %vm119_vm0, %v1641_v26, 0.0  ;;  %v4511_v25 = vld [vmem:[#allocation2] ss:$0 sm:$0xff] }
 0xc42   :  { %1647 = vadd.xlane.f32.xlu1 %v1646_v60  ;;  %1650 = vadd.xlane.f32.xlu0 %v1649_v28 }
 0xc43   :  { %v1642_v29 = vmul.f32 %v1638_v27, %v1638_v27 }
 0xc45   :  { %v1652_v30 = vsel %vm119_vm0, %v1642_v29, 0.0 }
 0xc46   :  { %1653 = vadd.xlane.f32.xlu1 %v1652_v30  ;;  %v4515_v30 = vld [vmem:[#allocation2 + $0x1] ss:$0 sm:$0xff] }
 0xcc7   :  { %v1645_v33 = vpop.xlane.xlu0 %1644 }
 0xcc8   :  { %v1655_v34 = vmul.f32 0.03125, %v1645_v33 }
 0xcca   :  { %v1659_v35 = vadd.f32 1e-12, %v1655_v34 }
 0xccb   :  { %v1648_v36 = vpop.xlane.xlu1 %1647  ;;  %v1651_v37 = vpop.xlane.xlu0 %1650 }
 0xccc   :  { %3806 = vrsqrt.f32 %v1659_v35  ;;  %v1656_v24 = vmul.f32 0.03125, %v1648_v36  ;;  %v1657_v39 = vmul.f32 0.03125, %v1651_v37  ;;  %v4519_v37 = vld [vmem:[#allocation2 + $0x2] ss:$0 sm:$0xff] }
 0xcce   :  { %v1660_v55 = vadd.f32 1e-12, %v1656_v24  ;;  %v1661_v58 = vadd.f32 1e-12, %v1657_v39 }
 0xccf   :  { %v1654_v61 = vpop.xlane.xlu1 %1653 }
 0xcd0   :  { %3808 = vrsqrt.f32 %v1660_v55  ;;  %v1658_v40 = vmul.f32 0.03125, %v1654_v61 }
 0xcd1   :  { %3810 = vrsqrt.f32 %v1661_v58 }
 0xcd2   :  { %v1662_v3 = vadd.f32 1e-12, %v1658_v40 }
 0xcd4   :  { %3812 = vrsqrt.f32 %v1662_v3  ;;  %v4523_v3 = vld [vmem:[#allocation2 + $0x3] ss:$0 sm:$0xff] }
 0xcd9   :  { %v3807_v7 = vpop.eup %3806 }
 0xcda   :  { %v1667_v41 = vmul.f32 %v3807_v7, %v1635_v17 }
 0xcdc   :  { %v1677_v43 = vmul.f32 %v3266_v10, %v1667_v41 }
 0xcdd   :  { %v3809_v44 = vpop.eup %3808 }
 0xcde   :  { %v3811_v31 = vpop.eup %3810  ;;  %v1668_v45 = vmul.f32 %v3809_v44, %v1636_v63  ;;  %v4444_v46 = vadd.f32 %v3267_v42, %v1677_v43 }
 0xcdf   :  { %v1669_v47 = vmul.f32 %v3811_v31, %v1637_v22 }
 0xce0   :  { %v1678_v48 = vmul.f32 %v3266_v10, %v1668_v45  ;;  %3173 = vst.msk [vmem:[#allocation10] sm:$0xff] %vm119_vm0, %v4444_v46 }
 0xce1   :  { %v3813_v49 = vpop.eup %3812  ;;  %v1679_v38 = vmul.f32 %v3266_v10, %v1669_v47 }
 0xce2   :  { %v1670_v50 = vmul.f32 %v3813_v49, %v1638_v27  ;;  %v4448_v51 = vadd.f32 %v3267_v42, %v1678_v48 }
 0xce3   :  { %v4450_v52 = vadd.f32 %v3267_v42, %v1679_v38 }
 0xce4   :  { %v1680_v56 = vmul.f32 %v3266_v10, %v1670_v50  ;;  %v1691_v0 = vpack.c.bf16 %v4448_v51, %v4444_v46  ;;  %3174 = vst.msk [vmem:[#allocation10 + $0x8] sm:$0xff] %vm119_vm0, %v4448_v51 }
 0xce5   :  { %3175 = vst.msk [vmem:[#allocation10 + $0x10] sm:$0xff] %vm119_vm0, %v4450_v52 }
 0xce6   :  { %3580 = vmatprep.mubr.msk.bf16.mxu1 %vm119_vm0, %v1691_v0  ;;  %v4459_v1 = vadd.f32 %v3267_v42, %v1680_v56 }
 0xce8   :  { %v1692_v6 = vpack.c.bf16 %v4459_v1, %v4450_v52  ;;  %3176 = vst.msk [vmem:[#allocation10 + $0x18] sm:$0xff] %vm119_vm0, %v4459_v1 }
 0xcea   :  { %3581 = vmatmul.mubr.msk.bf16.vlgmr.msra.gmra.mxu1 %vm119_vm0, %v1692_v6 }
 0xceb   :  { %3586 = vmatprep.mubr.msk.bf16.mxu1 %vm4013_vm1, %v4012_v62 }
 0xdaa   :  { %v3582_v8 = vpop.f32.mrf.mxu1 }
 0xdab   :  { %v1767_v57 = vadd.f32 %v3582_v8, %v3273_v12 }
 0xdac   :  { %v1758_v9 = vpop.f32.mrf.mxu1 }
 0xdad   :  { %v1759_v13 = vadd.f32 %v3273_v12, %v1758_v9  ;;  %v4479_v53 = vpack.c.bf16 %v1767_v57, %v1767_v57 }
 0xdae   :  { %v3583_v4 = vpop.f32.mrf.mxu1 }
 0xdaf   :  { %v4471_v14 = vpack.c.bf16 %v1759_v13, %v1759_v13  ;;  %v1770_v17 = vadd.f32 %v3583_v4, %v3273_v12 }
 0xdb0   :  { %v1761_v15 = vpop.f32.mrf.mxu1 }
 0xdb1   :  { %v1762_v11 = vadd.f32 %v3273_v12, %v1761_v15  ;;  %1778 = vrot.lane.b32.xlu0 %v4471_v14, %s4014_s19  ;;  %v4483_v18 = vpack.c.bf16 %v1770_v17, %v1770_v17 }
 0xdb3   :  { %v4475_v16 = vpack.c.bf16 %v1762_v11, %v1762_v11 }
 0xdb5   :  { %1827 = vrot.lane.b32.xlu1 %v4475_v16, %s4014_s19 }
 0xdb9   :  { %1876 = vrot.lane.b32.xlu1 %v4479_v53, %s4014_s19 }
 0xdbd   :  { %1925 = vrot.lane.b32.xlu1 %v4483_v18, %s4014_s19 }
 0xe23   :  { %v1779_v19 = vpop.permute.xlu0 %1778 }
 0xe24   :  { %v1784_v2 = vsel %vm304_vm2, %v1779_v19, 0 }
 0xe25   :  { %3585 = vmatpush3.bf16.xpose.msra.mxu1 %v1784_v2 }
 0xe26   :  { %3596 = vmatprep.subr.bf16.mxu1 %v4012_v62 }
 0xe27   :  { %v1828_v21 = vpop.permute.xlu1 %1827 }
 0xe28   :  { %v1833_v59 = vsel %vm304_vm2, %v1828_v21, 0 }
 0xe29   :  { %3591 = vmatpush3.bf16.xpose.msra.mxu0 %v1833_v59 }
 0xe2a   :  { %3602 = vmatprep.subr.bf16.mxu0 %v4012_v62 }
 0xe2b   :  { %v1877_v63 = vpop.permute.xlu1 %1876 }
 0xe2c   :  { %v1882_v22 = vsel %vm304_vm2, %v1877_v63, 0  ;;  %3587 = vmatmul.mubr.msk.bf16.vlgmr.msra.gmra.mxu1 %vm304_vm2, %v4471_v14 }
 0xe2d   :  { %3597 = vmatpush3.bf16.xpose.msra.mxu1 %v1882_v22  ;;  %3598 = vmatprep.mubr.msk.bf16.mxu1 %vm4013_vm1, %v4012_v62 }
 0xe2e   :  { %3608 = vmatprep.subr.bf16.mxu1 %v4012_v62 }
 0xe2f   :  { %v1926_v23 = vpop.permute.xlu1 %1925 }
 0xe30   :  { %v1931_v54 = vsel %vm304_vm2, %v1926_v23, 0  ;;  %3593 = vmatmul.mubr.msk.bf16.vlgmr.msra.gmra.mxu0 %vm304_vm2, %v4475_v16 }
 0xe31   :  { %3603 = vmatpush3.bf16.xpose.msra.mxu0 %v1931_v54  ;;  %3604 = vmatprep.mubr.msk.bf16.mxu0 %vm4013_vm1, %v4012_v62 }
 0xe32   :  { %3614 = vmatprep.subr.bf16.mxu0 %v4012_v62 }
 0xe34   :  { %3599 = vmatmul.mubr.msk.bf16.vlgmr.msra.gmra.mxu1 %vm304_vm2, %v4479_v53 }
 0xe35   :  { %3610 = vmatprep.mubr.msk.bf16.mxu1 %vm4013_vm1, %v4012_v62 }
 0xe38   :  { %3605 = vmatmul.mubr.msk.bf16.vlgmr.msra.gmra.mxu0 %vm304_vm2, %v4483_v18 }
 0xe39   :  { %3616 = vmatprep.mubr.msk.bf16.mxu0 %vm4013_vm1, %v4012_v62 }
 0xeec   :  { %v1820_v5 = vpop.f32.mrf.mxu1 }
 0xeed   :  { %v1821_v26 = vadd.f32 %v4511_v25, %v1820_v5 }
 0xeee   :  { %v3588_v27 = vpop.f32.mrf.mxu1 }
 0xeef   :  { %v1973_v60 = vsel %vm498_vm3, %v1821_v26, -inf }
 0xef0   :  { %v1869_v28 = vpop.f32.mrf.mxu0  ;;  %1974 = vmax.xlane.f32.xlu0 %v1973_v60  ;;  %v1823_v29 = vpop.f32.mrf.mxu1 }
 0xef1   :  { %v1870_v32 = vadd.f32 %v4515_v30, %v1869_v28 }
 0xef2   :  { %v3589_v20 = vpop.f32.mrf.mxu1  ;;  %v3594_v33 = vpop.f32.mrf.mxu0 }
 0xef3   :  { %v1976_v34 = vsel %vm498_vm3, %v1870_v32, -inf }
 0xef4   :  { %1977 = vmax.xlane.f32.xlu1 %v1976_v34  ;;  %v1872_v35 = vpop.f32.mrf.mxu0  ;;  %v1918_v36 = vpop.f32.mrf.mxu1 }
 0xef5   :  { %v1919_v24 = vadd.f32 %v4519_v37, %v1918_v36 }
 0xef6   :  { %v3595_v39 = vpop.f32.mrf.mxu0  ;;  %v3600_v55 = vpop.f32.mrf.mxu1 }
 0xef7   :  { %v1979_v58 = vsel %vm498_vm3, %v1919_v24, -inf }
 0xef8   :  { %v1967_v61 = vpop.f32.mrf.mxu0  ;;  %1980 = vmax.xlane.f32.xlu0 %v1979_v58  ;;  %v1921_v40 = vpop.f32.mrf.mxu1 }
 0xef9   :  { %v1968_v7 = vadd.f32 %v4523_v3, %v1967_v61 }
 0xefa   :  { %v3601_v10 = vpop.f32.mrf.mxu1  ;;  %v3606_v41 = vpop.f32.mrf.mxu0 }
 0xefb   :  { %v1982_v42 = vsel %vm498_vm3, %v1968_v7, -inf }
 0xefc   :  { %v1970_v43 = vpop.f32.mrf.mxu0  ;;  %1983 = vmax.xlane.f32.xlu0 %v1982_v42 }
 0xefe   :  { %v3607_v44 = vpop.f32.mrf.mxu0 }
 0xf05   :  { %2069 = vrot.lane.b32.xlu1 %v4475_v16, %s4010_s27 }
 0xf09   :  { %2117 = vrot.lane.b32.xlu1 %v4479_v53, %s4010_s27 }
 0xf0d   :  { %2165 = vrot.lane.b32.xlu1 %v4483_v18, %s4010_s27 }
 0xf79   :  { %v1975_v31 = vpop.xlane.xlu0 %1974 }
 0xf7a   :  { %v1985_v45 = vsub.f32 %v1821_v26, %v1975_v31 }
 0xf7c   :  { %v1989_v47 = vmul.f32 1.442695, %v1985_v45 }
 0xf7d   :  { %v1978_v48 = vpop.xlane.xlu1 %1977 }
 0xf7e   :  { %3814 = vpow2.f32 %v1989_v47  ;;  %v1986_v49 = vsub.f32 %v1870_v32, %v1978_v48 }
 0xf80   :  { %v1991_v38 = vmul.f32 1.442695, %v1986_v49 }
 0xf81   :  { %v2070_v50 = vpop.permute.xlu1 %2069  ;;  %v1981_v9 = vpop.xlane.xlu0 %1980 }
 0xf82   :  { %3816 = vpow2.f32 %v1991_v38  ;;  %v2075_v56 = vsel %vm552_vm4, %v2070_v50, 0  ;;  %v1987_v13 = vsub.f32 %v1919_v24, %v1981_v9 }
 0xf83   :  { %3615 = vmatpush3.bf16.msra.mxu0 %v2075_v56 }
 0xf84   :  { %3626 = vmatprep.subr.bf16.mxu0 %v4012_v62  ;;  %v1993_v15 = vmul.f32 1.442695, %v1987_v13 }
 0xf85   :  { %v1984_v4 = vpop.xlane.xlu0 %1983  ;;  %v2118_v59 = vpop.permute.xlu1 %2117 }
 0xf86   :  { %v1988_v11 = vsub.f32 %v1968_v7, %v1984_v4  ;;  %3818 = vpow2.f32 %v1993_v15  ;;  %v2123_v29 = vsel %vm552_vm4, %v2118_v59, 0 }
 0xf88   :  { %v1995_v57 = vmul.f32 1.442695, %v1988_v11 }
 0xf89   :  { %v2166_v63 = vpop.permute.xlu1 %2165 }
 0xf8a   :  { %3820 = vpow2.f32 %v1995_v57  ;;  %v2171_v33 = vsel %vm552_vm4, %v2166_v63, 0 }
 0xf8b   :  { %v3815_v0 = vpop.eup %3814 }
 0xf8c   :  { %v1997_v6 = vsel %vm498_vm3, %v3815_v0, 0.0 }
 0xf8d   :  { %1998 = vadd.xlane.f32.xlu0 %v1997_v6 }
 0xf8f   :  { %v3817_v8 = vpop.eup %3816 }
 0xf90   :  { %v2000_v12 = vsel %vm498_vm3, %v3817_v8, 0.0 }
 0xf91   :  { %2001 = vadd.xlane.f32.xlu1 %v2000_v12 }
 0xf93   :  { %v3819_v17 = vpop.eup %3818 }
 0xf94   :  { %v2003_v19 = vsel %vm498_vm3, %v3819_v17, 0.0 }
 0xf97   :  { %v3821_v2 = vpop.eup %3820 }
 0xf98   :  { %v2006_v21 = vsel %vm498_vm3, %v3821_v2, 0.0 }
 0xfa2   :  { %2270 = vrot.lane.b32.xlu1 %v4475_v16, %s4015_s1 }
 0xfa3   :  { %2021 = vrot.lane.b32.xlu0 %v4471_v14, %s4010_s27 }
 0xfc2   :  { %2004 = vadd.xlane.f32.xlu0 %v2003_v19 }
 0xfc6   :  { %2007 = vadd.xlane.f32.xlu1 %v2006_v21 }
 0xfd7   :  { %2268 = vrot.lane.b32.xlu1 %v4475_v16, %s4016_s3 }
 0xfd8   :  { %2220 = vrot.lane.b32.xlu0 %v4471_v14, %s4015_s1 }
 0xfdb   :  { %2370 = vrot.lane.b32.xlu1 %v4483_v18, %s4015_s1 }
 0xfdc   :  { %2218 = vrot.lane.b32.xlu0 %v4471_v14, %s4016_s3 }
 0xfdf   :  { %2368 = vrot.lane.b32.xlu1 %v4483_v18, %s4016_s3 }
 0xfe0   :  { %2320 = vrot.lane.b32.xlu0 %v4479_v53, %s4015_s1 }
 0xfe4   :  { %2318 = vrot.lane.b32.xlu0 %v4479_v53, %s4016_s3 }
0x1016   :  { %v1999_v22 = vpop.xlane.xlu0 %1998 }
0x1017   :  { %3822 = vrcp.f32 %v1999_v22 }
0x101a   :  { %v2002_v23 = vpop.xlane.xlu1 %2001  ;;  %v2022_v54 = vpop.permute.xlu0 %2021 }
0x101b   :  { %3824 = vrcp.f32 %v2002_v23  ;;  %v2027_v5 = vsel %vm552_vm4, %v2022_v54, 0 }
0x101c   :  { %3609 = vmatpush3.bf16.msra.mxu1 %v2027_v5 }
0x101d   :  { %3620 = vmatprep.subr.bf16.mxu1 %v4012_v62 }
0x101e   :  { %v2271_v34 = vpop.permute.xlu1 %2270 }
0x101f   :  { %v2276_v43 = vsel %vm304_vm2, %v2271_v34, 0 }
0x1024   :  { %v3823_v26 = vpop.eup %3822 }
0x1025   :  { %v2010_v27 = vmul.f32 %v3823_v26, %v3815_v0 }
0x1027   :  { %v2017_v60 = vpack.c.bf16 %v2010_v27, %v2010_v27 }
0x1028   :  { %v3825_v28 = vpop.eup %3824 }
0x1029   :  { %3611 = vmatmul.mubr.msk.bf16.vlgmr.msra.gmra.mxu1 %vm498_vm3, %v2017_v60  ;;  %v2012_v32 = vmul.f32 %v3825_v28, %v3817_v8 }
0x102a   :  { %3621 = vmatpush3.bf16.msra.mxu1 %v2123_v29  ;;  %3622 = vmatprep.mubr.msk.bf16.mxu1 %vm4013_vm1, %v4012_v62 }
0x102b   :  { %v2018_v20 = vpack.c.bf16 %v2012_v32, %v2012_v32  ;;  %3632 = vmatprep.subr.bf16.mxu1 %v4012_v62 }
0x102d   :  { %3617 = vmatmul.mubr.msk.bf16.vlgmr.msra.gmra.mxu0 %vm498_vm3, %v2018_v20 }
0x102e   :  { %3627 = vmatpush3.bf16.msra.mxu0 %v2171_v33  ;;  %3628 = vmatprep.mubr.msk.bf16.mxu0 %vm4013_vm1, %v4012_v62 }
0x102f   :  { %3638 = vmatprep.subr.bf16.mxu0 %v4012_v62 }
0x104b   :  { %v2005_v35 = vpop.xlane.xlu0 %2004 }
0x104c   :  { %3826 = vrcp.f32 %v2005_v35 }
0x104f   :  { %v2008_v36 = vpop.xlane.xlu1 %2007  ;;  %v2221_v24 = vpop.permute.xlu0 %2220 }
0x1050   :  { %3828 = vrcp.f32 %v2008_v36  ;;  %v2226_v7 = vsel %vm304_vm2, %v2221_v24, 0 }
0x1053   :  { %v2219_v40 = vpop.permute.xlu0 %2218  ;;  %v2269_v42 = vpop.permute.xlu1 %2268 }
0x1057   :  { %v2321_v44 = vpop.permute.xlu0 %2320  ;;  %v2371_v45 = vpop.permute.xlu1 %2370 }
0x1058   :  { %v2326_v31 = vsel %vm304_vm2, %v2321_v44, 0  ;;  %v2376_v47 = vsel %vm304_vm2, %v2371_v45, 0 }
0x1059   :  { %v3827_v39 = vpop.eup %3826 }
0x105a   :  { %v2014_v55 = vmul.f32 %v3827_v39, %v3819_v17 }
0x105b   :  { %v2319_v48 = vpop.permute.xlu0 %2318  ;;  %v2369_v49 = vpop.permute.xlu1 %2368 }
0x105c   :  { %v2019_v58 = vpack.c.bf16 %v2014_v55, %v2014_v55 }
0x105d   :  { %v3829_v61 = vpop.eup %3828 }
0x105e   :  { %3623 = vmatmul.mubr.msk.bf16.vlgmr.msra.gmra.mxu1 %vm498_vm3, %v2019_v58  ;;  %v2016_v10 = vmul.f32 %v3829_v61, %v3821_v2 }
0x105f   :  { %3633 = vmatpush3.bf16.xpose.msra.mxu1 %v2226_v7  ;;  %3634 = vmatprep.mubr.msk.bf16.mxu1 %vm4013_vm1, %v4012_v62 }
0x1060   :  { %v2020_v41 = vpack.c.bf16 %v2016_v10, %v2016_v10  ;;  %3644 = vmatprep.subr.bf16.mxu1 %v4012_v62 }
0x1062   :  { %3629 = vmatmul.mubr.msk.bf16.vlgmr.msra.gmra.mxu0 %vm498_vm3, %v2020_v41 }
0x1063   :  { %3639 = vmatpush3.bf16.xpose.msra.mxu0 %v2276_v43  ;;  %3640 = vmatprep.mubr.msk.bf16.mxu0 %vm4013_vm1, %v4012_v62 }
0x1064   :  { %3650 = vmatprep.subr.bf16.mxu0 %v4012_v62 }
0x1066   :  { %3635 = vmatmul.mubr.msk.bf16.vlgmr.msra.gmra.mxu1 %vm304_vm2, %v2219_v40 }
0x1067   :  { %3645 = vmatpush3.bf16.xpose.msra.mxu1 %v2326_v31  ;;  %3646 = vmatprep.mubr.msk.bf16.mxu1 %vm4013_vm1, %v4012_v62 }
0x1068   :  { %3656 = vmatprep.subr.bf16.mxu1 %v4012_v62 }
0x106a   :  { %3641 = vmatmul.mubr.msk.bf16.vlgmr.msra.gmra.mxu0 %vm304_vm2, %v2269_v42 }
0x106b   :  { %3651 = vmatpush3.bf16.xpose.msra.mxu0 %v2376_v47  ;;  %3652 = vmatprep.mubr.msk.bf16.mxu0 %vm4013_vm1, %v4012_v62 }
0x106c   :  { %3662 = vmatprep.subr.bf16.mxu0 %v4012_v62 }
0x106e   :  { %3647 = vmatmul.mubr.msk.bf16.vlgmr.msra.gmra.mxu1 %vm304_vm2, %v2319_v48 }
0x106f   :  { %3658 = vmatprep.mubr.msk.bf16.mxu1 %vm4013_vm1, %v4012_v62 }
0x1072   :  { %3653 = vmatmul.mubr.msk.bf16.vlgmr.msra.gmra.mxu0 %vm304_vm2, %v2369_v49 }
0x1073   :  { %3664 = vmatprep.mubr.msk.bf16.mxu0 %vm4013_vm1, %v4012_v62 }
0x10e9   :  { %v4595_v38 = vpop.f32.mrf.mxu1 }
0x10eb   :  { %v3612_v50 = vpop.f32.mrf.mxu1 }
0x10ed   :  { %v2066_v56 = vpop.f32.mrf.mxu1  ;;  %v4597_v0 = vpop.f32.mrf.mxu0 }
0x10ee   :  { %v2213_v6 = vpack.c.bf16 %v4597_v0, %v4595_v38 }
0x10ef   :  { %v3613_v8 = vpop.f32.mrf.mxu1  ;;  %v3618_v12 = vpop.f32.mrf.mxu0 }
0x10f1   :  { %v2114_v9 = vpop.f32.mrf.mxu0 }
0x10f3   :  { %v3619_v13 = vpop.f32.mrf.mxu0 }
0x111e   :  { %v4601_v4 = vpop.f32.mrf.mxu1 }
0x1120   :  { %v3624_v15 = vpop.f32.mrf.mxu1 }
0x1122   :  { %v2162_v11 = vpop.f32.mrf.mxu1  ;;  %v4603_v57 = vpop.f32.mrf.mxu0 }
0x1123   :  { %v2214_v17 = vpack.c.bf16 %v4603_v57, %v4601_v4 }
0x1124   :  { %v3625_v19 = vpop.f32.mrf.mxu1  ;;  %v3630_v2 = vpop.f32.mrf.mxu0 }
0x1126   :  { %v2210_v21 = vpop.f32.mrf.mxu0  ;;  %v2262_v59 = vpop.f32.mrf.mxu1 }
0x1127   :  { %v2263_v63 = vadd.f32 %v4511_v25, %v2262_v59 }
0x1128   :  { %v3631_v22 = vpop.f32.mrf.mxu0  ;;  %v3636_v23 = vpop.f32.mrf.mxu1 }
0x1129   :  { %v2418_v54 = vsel %vm498_vm3, %v2263_v63, -inf }
0x112a   :  { %v2312_v5 = vpop.f32.mrf.mxu0  ;;  %2419 = vmax.xlane.f32.xlu0 %v2418_v54  ;;  %v2265_v26 = vpop.f32.mrf.mxu1 }
0x112b   :  { %v2313_v27 = vadd.f32 %v4515_v30, %v2312_v5 }
0x112c   :  { %v3637_v60 = vpop.f32.mrf.mxu1  ;;  %v3642_v28 = vpop.f32.mrf.mxu0 }
0x112d   :  { %v2421_v29 = vsel %vm498_vm3, %v2313_v27, -inf }
0x112e   :  { %2422 = vmax.xlane.f32.xlu1 %v2421_v29  ;;  %v2315_v32 = vpop.f32.mrf.mxu0  ;;  %v2362_v20 = vpop.f32.mrf.mxu1 }
0x112f   :  { %v2363_v33 = vadd.f32 %v4519_v37, %v2362_v20  ;;  %v3742_v32 = vld [vmem:[%s4752_s6 + $0x10] sm:$0xff]  }
0x1130   :  { %v3643_v34 = vpop.f32.mrf.mxu0  ;;  %v3648_v25 = vpop.f32.mrf.mxu1 }
0x1131   :  { %v2424_v35 = vsel %vm498_vm3, %v2363_v33, -inf }
0x1132   :  { %v2412_v36 = vpop.f32.mrf.mxu0  ;;  %2425 = vmax.xlane.f32.xlu0 %v2424_v35  ;;  %v2365_v24 = vpop.f32.mrf.mxu1 }
0x1133   :  { %v2413_v39 = vadd.f32 %v4523_v3, %v2412_v36 }
0x1134   :  { %v3649_v55 = vpop.f32.mrf.mxu1  ;;  %v3654_v30 = vpop.f32.mrf.mxu0 }
0x1135   :  { %v2427_v58 = vsel %vm498_vm3, %v2413_v39, -inf }
0x1136   :  { %v2415_v61 = vpop.f32.mrf.mxu0  ;;  %2428 = vmax.xlane.f32.xlu0 %v2427_v58 }
0x1138   :  { %v3655_v40 = vpop.f32.mrf.mxu0 }
0x11b3   :  { %v2420_v7 = vpop.xlane.xlu0 %2419 }
0x11b4   :  { %v2430_v10 = vsub.f32 %v2263_v63, %v2420_v7 }
0x11b6   :  { %v2434_v41 = vmul.f32 1.442695, %v2430_v10 }
0x11b7   :  { %v2423_v37 = vpop.xlane.xlu1 %2422 }
0x11b8   :  { %3830 = vpow2.f32 %v2434_v41  ;;  %v2431_v42 = vsub.f32 %v2313_v27, %v2423_v37 }
0x11ba   :  { %v2436_v43 = vmul.f32 1.442695, %v2431_v42 }
0x11bb   :  { %v2426_v44 = vpop.xlane.xlu0 %2425 }
0x11bc   :  { %3832 = vpow2.f32 %v2436_v43  ;;  %v2432_v31 = vsub.f32 %v2363_v33, %v2426_v44 }
0x11be   :  { %v2438_v45 = vmul.f32 1.442695, %v2432_v31 }
0x11bf   :  { %v2429_v8 = vpop.xlane.xlu0 %2428 }
0x11c0   :  { %3834 = vpow2.f32 %v2438_v45  ;;  %v2433_v12 = vsub.f32 %v2413_v39, %v2429_v8 }
0x11c2   :  { %v2440_v9 = vmul.f32 1.442695, %v2433_v12 }
0x11c4   :  { %3836 = vpow2.f32 %v2440_v9 }
0x11c5   :  { %v3831_v3 = vpop.eup %3830 }
0x11c6   :  { %v2442_v47 = vsel %vm498_vm3, %v3831_v3, 0.0 }
0x11c7   :  { %2443 = vadd.xlane.f32.xlu0 %v2442_v47 }
0x11c9   :  { %v3833_v48 = vpop.eup %3832 }
0x11ca   :  { %v2445_v49 = vsel %vm498_vm3, %v3833_v48, 0.0 }
0x11cb   :  { %2446 = vadd.xlane.f32.xlu1 %v2445_v49 }
0x11cd   :  { %v3835_v50 = vpop.eup %3834 }
0x11ce   :  { %v2448_v56 = vsel %vm498_vm3, %v3835_v50, 0.0 }
0x11cf   :  { %2449 = vadd.xlane.f32.xlu0 %v2448_v56 }
0x11d1   :  { %v3837_v13 = vpop.eup %3836 }
0x11d2   :  { %v2451_v15 = vsel %vm498_vm3, %v3837_v13, 0.0 }
0x11dc   :  { %2514 = vrot.lane.b32.xlu1 %v4475_v16, %s4017_s20 }
0x11e0   :  { %2562 = vrot.lane.b32.xlu1 %v4479_v53, %s4017_s20 }
0x11e5   :  { %2466 = vrot.lane.b32.xlu0 %v4471_v14, %s4017_s20 }
0x1204   :  { %2452 = vadd.xlane.f32.xlu1 %v2451_v15 }
0x1215   :  { %2610 = vrot.lane.b32.xlu1 %v4483_v18, %s4017_s20 }
0x1250   :  { %v2444_v11 = vpop.xlane.xlu0 %2443 }
0x1251   :  { %3838 = vrcp.f32 %v2444_v11 }
0x1254   :  { %v2447_v16 = vpop.xlane.xlu1 %2446 }
0x1255   :  { %3840 = vrcp.f32 %v2447_v16 }
0x1258   :  { %v2515_v19 = vpop.permute.xlu1 %2514  ;;  %v2450_v53 = vpop.xlane.xlu0 %2449 }
0x1259   :  { %v2520_v2 = vsel %vm552_vm4, %v2515_v19, 0  ;;  %3842 = vrcp.f32 %v2450_v53 }
0x125a   :  { %3663 = vmatpush3.bf16.msra.mxu0 %v2520_v2 }
0x125b   :  { %3674 = vmatprep.subr.bf16.mxu0 %v4012_v62 }
0x125c   :  { %v2467_v14 = vpop.permute.xlu0 %2466  ;;  %v2563_v63 = vpop.permute.xlu1 %2562 }
0x125d   :  { %v2472_v21 = vsel %vm552_vm4, %v2467_v14, 0  ;;  %v2568_v54 = vsel %vm552_vm4, %v2563_v63, 0 }
0x125e   :  { %v3839_v59 = vpop.eup %3838  ;;  %3657 = vmatpush3.bf16.msra.mxu1 %v2472_v21 }
0x125f   :  { %3668 = vmatprep.subr.bf16.mxu1 %v4012_v62  ;;  %v2455_v18 = vmul.f32 %v3839_v59, %v3831_v3  ;;  %v3305_v3 = vld [vmem:[%s4753_s7 + $0x1] ss:$0 sm:$0xff] }
0x1261   :  { %v2462_v22 = vpack.c.bf16 %v2455_v18, %v2455_v18 }
0x1262   :  { %v3841_v23 = vpop.eup %3840 }
0x1263   :  { %3659 = vmatmul.mubr.msk.bf16.vlgmr.msra.gmra.mxu1 %vm498_vm3, %v2462_v22  ;;  %v2457_v5 = vmul.f32 %v3841_v23, %v3833_v48 }
0x1264   :  { %3669 = vmatpush3.bf16.msra.mxu1 %v2568_v54  ;;  %3670 = vmatprep.mubr.msk.bf16.mxu1 %vm4013_vm1, %v4012_v62 }
0x1265   :  { %v2463_v26 = vpack.c.bf16 %v2457_v5, %v2457_v5 }
0x1266   :  { %v3843_v27 = vpop.eup %3842 }
0x1267   :  { %3665 = vmatmul.mubr.msk.bf16.vlgmr.msra.gmra.mxu0 %vm498_vm3, %v2463_v26  ;;  %v2459_v60 = vmul.f32 %v3843_v27, %v3835_v50 }
0x1268   :  { %3676 = vmatprep.mubr.msk.bf16.mxu0 %vm4013_vm1, %v4012_v62  ;;  %v3743_v62 = vld [vmem:[%s4752_s6 + $0x18] sm:$0xff]  }
0x1269   :  { %v2464_v28 = vpack.c.bf16 %v2459_v60, %v2459_v60  ;;  %3680 = vmatprep.subr.bf16.mxu1 %v3743_v62 }
0x126b   :  { %3671 = vmatmul.mubr.msk.bf16.vlgmr.msra.gmra.mxu1 %vm498_vm3, %v2464_v28 }
0x126c   :  { %3681 = vmatpush3.bf16.msra.mxu1 %v3743_v62  ;;  %v3744_v62 = vld [vmem:[#allocation8 + $0x18] sm:$0xff]  }
0x126d   :  { %3692 = vmatprep.subr.bf16.mxu1 %v3744_v62 }
0x128d   :  { %v2453_v29 = vpop.xlane.xlu1 %2452 }
0x128e   :  { %3844 = vrcp.f32 %v2453_v29 }
0x1291   :  { %v2611_v20 = vpop.permute.xlu1 %2610 }
0x1292   :  { %v2616_v33 = vsel %vm552_vm4, %v2611_v20, 0 }
0x1293   :  { %3675 = vmatpush3.bf16.msra.mxu0 %v2616_v33 }
0x1294   :  { %3686 = vmatprep.subr.bf16.mxu0 %v3742_v32 }
0x129b   :  { %v3845_v34 = vpop.eup %3844 }
0x129c   :  { %v2461_v25 = vmul.f32 %v3845_v34, %v3837_v13 }
0x129e   :  { %v2465_v35 = vpack.c.bf16 %v2461_v25, %v2461_v25 }
0x12a0   :  { %3677 = vmatmul.mubr.msk.bf16.vlgmr.msra.gmra.mxu0 %vm498_vm3, %v2465_v35 }
0x12a1   :  { %3688 = vmatprep.mubr.msk.bf16.mxu0 %vm304_vm2, %v2213_v6  ;;  %3687 = vmatpush3.bf16.msra.mxu0 %v3742_v32 }
0x12a8   :  { %3689 = vmatmul.mubr.msk.bf16.vlgmr.msra.gmra.mxu0 %vm304_vm2, %v2214_v17 }
0x1323   :  { %v2508_v36 = vpop.f32.mrf.mxu1 }
0x1325   :  { %v3660_v24 = vpop.f32.mrf.mxu1 }
0x1327   :  { %v2511_v39 = vpop.f32.mrf.mxu1  ;;  %v2556_v55 = vpop.f32.mrf.mxu0 }
0x1328   :  { %v2658_v30 = vpack.c.bf16 %v2556_v55, %v2508_v36  ;;  %v3745_v36 = vld [vmem:[#allocation8 + $0x10] sm:$0xff]  }
0x1329   :  { %v3661_v38 = vpop.f32.mrf.mxu1  ;;  %v3666_v0 = vpop.f32.mrf.mxu0 }
0x132a   :  { %3682 = vmatprep.mubr.msk.bf16.mxu1 %vm304_vm2, %v2658_v30 }
0x132b   :  { %v2559_v6 = vpop.f32.mrf.mxu0  ;;  %v2604_v58 = vpop.f32.mrf.mxu1 }
0x132d   :  { %v3667_v4 = vpop.f32.mrf.mxu0  ;;  %v3672_v57 = vpop.f32.mrf.mxu1 }
0x132f   :  { %v2607_v17 = vpop.f32.mrf.mxu1 }
0x1331   :  { %v3673_v61 = vpop.f32.mrf.mxu1 }
0x1360   :  { %v2652_v40 = vpop.f32.mrf.mxu0 }
0x1361   :  { %v2659_v7 = vpack.c.bf16 %v2652_v40, %v2604_v58 }
0x1362   :  { %v3678_v10 = vpop.f32.mrf.mxu0 }
0x1363   :  { %3683 = vmatmul.mubr.msk.bf16.vlgmr.msra.gmra.mxu1 %vm304_vm2, %v2659_v7  ;;  %v3308_v10 = vld [vmem:[%s4754_s8 + $0x1] ss:$0 sm:$0xff] }
0x1364   :  { %v2655_v41 = vpop.f32.mrf.mxu0  ;;  %3693 = vmatpush3.bf16.msra.mxu1 %v3744_v62 }
0x1365   :  { %3694 = vmatprep.subr.bf16.mxu1 %v3745_v36 }
0x1366   :  { %v3679_v37 = vpop.f32.mrf.mxu0 }
0x1368   :  { %v3690_v42 = vpop.f32.mrf.mxu0  ;;  %3695 = vmatpush3.bf16.msra.mxu1 %v3745_v36 }
0x136a   :  { %v2770_v43 = vpop.f32.mrf.mxu0 }
0x136c   :  { %v3691_v45 = vpop.f32.mrf.mxu0 }
0x136e   :  { %v2773_v12 = vpop.f32.mrf.mxu0 }
0x1423   :  { %v3684_v44 = vpop.f32.mrf.mxu1 }
0x1424   :  { %v2779_v31 = vadd.f32 %v3690_v42, %v3684_v44 }
0x1425   :  { %v2709_v47 = vpop.f32.mrf.mxu1 }
0x1426   :  { %v2771_v48 = vadd.f32 %v2770_v43, %v2709_v47  ;;  %v2795_v50 = vadd.f32 %v3305_v3, %v2779_v31  ;;  %v3309_v31 = vld [vmem:[%s4755_s9 + $0x1] ss:$0 sm:$0xff] }
0x1427   :  { %v3685_v49 = vpop.f32.mrf.mxu1 }
0x1428   :  { %v2793_v56 = vadd.f32 %v3305_v3, %v2771_v48  ;;  %v2782_v8 = vadd.f32 %v3691_v45, %v3685_v49  ;;  %v2799_v53 = vadd.f32 %v2795_v50, %v4450_v52 }
0x1429   :  { %v2712_v9 = vpop.f32.mrf.mxu1 }
0x142a   :  { %v2774_v13 = vadd.f32 %v2773_v12, %v2712_v9  ;;  %v2797_v15 = vadd.f32 %v2793_v56, %v4444_v46  ;;  %v2796_v11 = vadd.f32 %v3305_v3, %v2782_v8  ;;  %v2811_v14 = vsel %vm119_vm0, %v2799_v53, 0.0 }
0x142c   :  { %v2794_v16 = vadd.f32 %v3305_v3, %v2774_v13  ;;  %v2805_v19 = vsel %vm119_vm0, %v2797_v15, 0.0  ;;  %v2800_v59 = vadd.f32 %v2796_v11, %v4459_v1  ;;  %v3747_v11 = vld [vmem:[%s4758_s12 + $0x30] sm:$0xff]  }
0x142d   :  { %2806 = vadd.xlane.f32.xlu0 %v2805_v19  ;;  %v3749_v19 = vld [vmem:[%s4758_s12 + $0x20] sm:$0xff]  }
0x142e   :  { %v2798_v2 = vadd.f32 %v2794_v16, %v4448_v51  ;;  %v2814_v18 = vsel %vm119_vm0, %v2800_v59, 0.0  ;;  %v3748_v16 = vld [vmem:[%s4758_s12 + $0x28] sm:$0xff]  }
0x1430   :  { %v2808_v21 = vsel %vm119_vm0, %v2798_v2, 0.0 }
0x1431   :  { %2812 = vadd.xlane.f32.xlu0 %v2811_v14  ;;  %2809 = vadd.xlane.f32.xlu1 %v2808_v21 }
0x1435   :  { %2815 = vadd.xlane.f32.xlu0 %v2814_v18 }
0x14b6   :  { %v2807_v46 = vpop.xlane.xlu0 %2806 }
0x14b7   :  { %v2817_v63 = vmul.f32 0.03125, %v2807_v46 }
0x14b9   :  { %v2821_v22 = vsub.f32 %v2797_v15, %v2817_v63  ;;  %v3746_v15 = vld [vmem:[%s4758_s12 + $0x38] sm:$0xff]  }
0x14ba   :  { %v2813_v23 = vpop.xlane.xlu0 %2812  ;;  %v2810_v54 = vpop.xlane.xlu1 %2809  ;;  %3700 = vmatprep.subr.bf16.mxu0 %v3746_v15 }
0x14bb   :  { %v2819_v52 = vmul.f32 0.03125, %v2813_v23  ;;  %v2818_v5 = vmul.f32 0.03125, %v2810_v54  ;;  %v2825_v26 = vmul.f32 %v2821_v22, %v2821_v22  ;;  %3701 = vmatpush3.bf16.msra.mxu0 %v3746_v15 }
0x14bc   :  { %3702 = vmatprep.subr.bf16.mxu0 %v3747_v11 }
0x14bd   :  { %v2823_v51 = vsub.f32 %v2799_v53, %v2819_v52  ;;  %v2822_v27 = vsub.f32 %v2798_v2, %v2818_v5  ;;  %v2829_v60 = vsel %vm119_vm0, %v2825_v26, 0.0  ;;  %v3311_v53 = vld [vmem:[%s4757_s11 + $0x1] ss:$0 sm:$0xff] }
0x14be   :  { %2830 = vadd.xlane.f32.xlu0 %v2829_v60  ;;  %v2816_v28 = vpop.xlane.xlu0 %2815 }
0x14bf   :  { %v2820_v1 = vmul.f32 0.03125, %v2816_v28  ;;  %v2827_v29 = vmul.f32 %v2823_v51, %v2823_v51  ;;  %v2826_v32 = vmul.f32 %v2822_v27, %v2822_v27  ;;  %3703 = vmatpush3.bf16.msra.mxu0 %v3747_v11 }
0x14c0   :  { %3704 = vmatprep.subr.bf16.mxu0 %v3748_v16 }
0x14c1   :  { %v2824_v20 = vsub.f32 %v2800_v59, %v2820_v1  ;;  %v2835_v33 = vsel %vm119_vm0, %v2827_v29, 0.0  ;;  %v2832_v34 = vsel %vm119_vm0, %v2826_v32, 0.0 }
0x14c2   :  { %2836 = vadd.xlane.f32.xlu0 %v2835_v33  ;;  %2833 = vadd.xlane.f32.xlu1 %v2832_v34 }
0x14c3   :  { %v2828_v25 = vmul.f32 %v2824_v20, %v2824_v20  ;;  %3705 = vmatpush3.bf16.msra.mxu0 %v3748_v16 }
0x14c4   :  { %3706 = vmatprep.subr.bf16.mxu0 %v3749_v19 }
0x14c5   :  { %v2838_v35 = vsel %vm119_vm0, %v2828_v25, 0.0 }
0x14c6   :  { %2839 = vadd.xlane.f32.xlu1 %v2838_v35 }
0x14c7   :  { %3707 = vmatpush3.bf16.msra.mxu0 %v3749_v19 }
0x1547   :  { %v2831_v24 = vpop.xlane.xlu0 %2830 }
0x1548   :  { %v2841_v39 = vmul.f32 0.03125, %v2831_v24 }
0x154a   :  { %v2845_v55 = vadd.f32 1e-12, %v2841_v39 }
0x154b   :  { %v2837_v30 = vpop.xlane.xlu0 %2836  ;;  %v2834_v38 = vpop.xlane.xlu1 %2833 }
0x154c   :  { %3846 = vrsqrt.f32 %v2845_v55  ;;  %v2843_v0 = vmul.f32 0.03125, %v2837_v30  ;;  %v2842_v6 = vmul.f32 0.03125, %v2834_v38 }
0x154e   :  { %v2847_v58 = vadd.f32 1e-12, %v2843_v0  ;;  %v2846_v4 = vadd.f32 1e-12, %v2842_v6 }
0x154f   :  { %v2840_v57 = vpop.xlane.xlu1 %2839 }
0x1550   :  { %3848 = vrsqrt.f32 %v2847_v58  ;;  %v2844_v17 = vmul.f32 0.03125, %v2840_v57 }
0x1551   :  { %3850 = vrsqrt.f32 %v2846_v4 }
0x1552   :  { %v2848_v61 = vadd.f32 1e-12, %v2844_v17 }
0x1554   :  { %3852 = vrsqrt.f32 %v2848_v61 }
0x1559   :  { %v3847_v40 = vpop.eup %3846 }
0x155a   :  { %v2853_v7 = vmul.f32 %v3847_v40, %v2821_v22 }
0x155c   :  { %v2863_v44 = vmul.f32 %v3308_v10, %v2853_v7 }
0x155d   :  { %v3849_v41 = vpop.eup %3848 }
0x155e   :  { %v3851_v37 = vpop.eup %3850  ;;  %v2855_v42 = vmul.f32 %v3849_v41, %v2823_v51  ;;  %v4678_v49 = vadd.f32 %v3309_v31, %v2863_v44 }
0x155f   :  { %v2854_v43 = vmul.f32 %v3851_v37, %v2822_v27 }
0x1560   :  { %v2865_v48 = vmul.f32 %v3308_v10, %v2855_v42 }
0x1561   :  { %v3853_v45 = vpop.eup %3852  ;;  %v2864_v3 = vmul.f32 %v3308_v10, %v2854_v43 }
0x1562   :  { %v2856_v47 = vmul.f32 %v3853_v45, %v2824_v20  ;;  %v4684_v12 = vadd.f32 %v3309_v31, %v2865_v48 }
0x1563   :  { %v4680_v50 = vadd.f32 %v3309_v31, %v2864_v3 }
0x1564   :  { %v2866_v56 = vmul.f32 %v3308_v10, %v2856_v47 }
0x1565   :  { %v2877_v8 = vpack.c.bf16 %v4680_v50, %v4678_v49 }
0x1566   :  { %v4686_v9 = vadd.f32 %v3309_v31, %v2866_v56  ;;  %v3325_v31 = vld [vmem:[%s4759_s13 + $0x1] ss:$0 sm:$0xff]  ;;  %s4018_s13 = smov [#allocation10]  }
0x1567   :  { %3696 = vmatprep.mubr.msk.bf16.mxu1 %vm119_vm0, %v2877_v8  ;;  %s3186_s22 = sshll.u32 %s4018_s13, 4  ;;  %s3187_s22 = int_to_ptr.vmem [resolvable:$true] %s3186_s22 }
0x1568   :  { %v2878_v13 = vpack.c.bf16 %v4686_v9, %v4684_v12  ;;  %s3954_s23 = scalar_lea.vmem %s3187_s22, 512  ;;  %p3959_p7 = scmp.lt.s32.totalorder %s3187_s22, %s3187_s22 }
0x1569   :  { %p3955_p6 = scmp.ne.s32.totalorder %s3187_s22, %s3954_s23  ;;  %p3960_p8 = scmp.lt.s32.totalorder %s3954_s23, %s3954_s23 }
0x156a   :  { %3697 = vmatmul.mubr.msk.bf16.vlgmr.msra.gmra.mxu1 %vm119_vm0, %v2878_v13 }
0x156b   :  { %p3961_p9 = por %p3960_p8, %p3959_p7 }
0x156d   :  { %p3962_p10 = pnand %p3961_p9, %p3955_p6 }
0x162a   :  { %v3698_v2 = vpop.f32.mrf.mxu1 }
0x162b   :  { %v2953_v14 = vadd.f32 %v3698_v2, %v3311_v53 }
0x162c   :  { %v2944_v21 = vpop.f32.mrf.mxu1 }
0x162d   :  { %v2965_v59 = vmul.f32 0.044715, %v2953_v14  ;;  %v2945_v18 = vadd.f32 %v3311_v53, %v2944_v21  ;;  %v2961_v40 = vmul.f32 0.5, %v2953_v14 }
0x162e   :  { %v3699_v46 = vpop.f32.mrf.mxu1 }
0x162f   :  { %v2969_v63 = vmul.f32 %v2965_v59, %v2953_v14  ;;  %v2963_v22 = vmul.f32 0.044715, %v2945_v18  ;;  %v2956_v23 = vadd.f32 %v3699_v46, %v3311_v53  ;;  %v2959_v57 = vmul.f32 0.5, %v2945_v18 }
0x1630   :  { %v2947_v54 = vpop.f32.mrf.mxu1 }
0x1631   :  { %v2973_v52 = vmul.f32 %v2969_v63, %v2953_v14  ;;  %v2967_v5 = vmul.f32 %v2963_v22, %v2945_v18  ;;  %v2966_v26 = vmul.f32 0.044715, %v2956_v23  ;;  %v2948_v51 = vadd.f32 %v3311_v53, %v2947_v54 }
0x1632   :  { %v2962_v58 = vmul.f32 0.5, %v2956_v23 }
0x1633   :  { %v2977_v27 = vadd.f32 %v2973_v52, %v2953_v14  ;;  %v2971_v60 = vmul.f32 %v2967_v5, %v2945_v18  ;;  %v2970_v28 = vmul.f32 %v2966_v26, %v2956_v23  ;;  %v2964_v1 = vmul.f32 0.044715, %v2948_v51 }
0x1634   :  { %v2960_v17 = vmul.f32 0.5, %v2948_v51 }
0x1635   :  { %v2981_v29 = vmul.f32 0.7978846, %v2977_v27  ;;  %v2975_v32 = vadd.f32 %v2971_v60, %v2945_v18  ;;  %v2974_v20 = vmul.f32 %v2970_v28, %v2956_v23  ;;  %v2968_v33 = vmul.f32 %v2964_v1, %v2948_v51 }
0x1637   :  { %v2979_v34 = vmul.f32 0.7978846, %v2975_v32  ;;  %v2978_v25 = vadd.f32 %v2974_v20, %v2956_v23  ;;  %v2972_v35 = vmul.f32 %v2968_v33, %v2948_v51  ;;  %3854 = vtanh.f32 %v2981_v29 }
0x1639   :  { %v2982_v62 = vmul.f32 0.7978846, %v2978_v25  ;;  %3856 = vtanh.f32 %v2979_v34  ;;  %v2976_v36 = vadd.f32 %v2972_v35, %v2948_v51 }
0x163b   :  { %3858 = vtanh.f32 %v2982_v62  ;;  %v2980_v24 = vmul.f32 0.7978846, %v2976_v36 }
0x163d   :  { %3860 = vtanh.f32 %v2980_v24 }
0x1644   :  { %v3855_v39 = vpop.eup %3854 }
0x1645   :  { %v2989_v4 = vadd.f32 1.0, %v3855_v39 }
0x1646   :  { %v3857_v55 = vpop.eup %3856 }
0x1647   :  { %v2987_v0 = vadd.f32 1.0, %v3857_v55  ;;  %v2993_v37 = vmul.f32 %v2989_v4, %v2961_v40 }
0x1648   :  { %v3859_v30 = vpop.eup %3858 }
0x1649   :  { %v2990_v38 = vadd.f32 1.0, %v3859_v30  ;;  %v2991_v10 = vmul.f32 %v2987_v0, %v2959_v57 }
0x164a   :  { %v3861_v6 = vpop.eup %3860 }
0x164b   :  { %v2988_v61 = vadd.f32 1.0, %v3861_v6  ;;  %v2994_v7 = vmul.f32 %v2990_v38, %v2962_v58 }
0x164d   :  { %v2992_v41 = vmul.f32 %v2988_v61, %v2960_v17  ;;  %v2996_v43 = vpack.c.bf16 %v2994_v7, %v2993_v37 }
0x164f   :  { %v2995_v42 = vpack.c.bf16 %v2992_v41, %v2991_v10 }
0x1651   :  { %3708 = vmatprep.mubr.msk.bf16.mxu0 %vm1557_vm5, %v2995_v42 }
0x1652   :  { %3709 = vmatmul.mubr.msk.bf16.vlgmr.msra.gmra.mxu0 %vm1557_vm5, %v2996_v43 }
0x1712   :  { %v3710_v44 = vpop.f32.mrf.mxu0 }
0x1713   :  { %v3087_v3 = vadd.f32 %v3710_v44, %v3325_v31 }
0x1714   :  { %v3078_v45 = vpop.f32.mrf.mxu0 }
0x1715   :  { %v3079_v47 = vadd.f32 %v3325_v31, %v3078_v45  ;;  %v3095_v13 = vadd.f32 %v3087_v3, %v4684_v12 }
0x1716   :  { %v3711_v48 = vpop.f32.mrf.mxu0 }
0x1717   :  { %v3093_v56 = vadd.f32 %v3079_v47, %v4678_v49  ;;  %v3090_v15 = vadd.f32 %v3711_v48, %v3325_v31  ;;  %v3107_v14 = vsel %vm119_vm0, %v3095_v13, 0.0 }
0x1718   :  { %v3081_v8 = vpop.f32.mrf.mxu0 }
0x1719   :  { %v3082_v11 = vadd.f32 %v3325_v31, %v3081_v8  ;;  %v3101_v16 = vsel %vm119_vm0, %v3093_v56, 0.0  ;;  %v3096_v53 = vadd.f32 %v3090_v15, %v4686_v9 }
0x171a   :  { %3102 = vadd.xlane.f32.xlu0 %v3101_v16 }
0x171b   :  { %v3094_v19 = vadd.f32 %v3082_v11, %v4680_v50  ;;  %v3110_v49 = vsel %vm119_vm0, %v3096_v53, 0.0 }
0x171d   :  { %v3104_v2 = vsel %vm119_vm0, %v3094_v19, 0.0 }
0x171e   :  { %3105 = vadd.xlane.f32.xlu1 %v3104_v2  ;;  %3108 = vadd.xlane.f32.xlu0 %v3107_v14 }
0x1722   :  { %3111 = vadd.xlane.f32.xlu1 %v3110_v49 }
0x17a3   :  { %v3103_v21 = vpop.xlane.xlu0 %3102 }
0x17a4   :  { %v3113_v12 = vmul.f32 0.03125, %v3103_v21 }
0x17a6   :  { %v3117_v59 = vsub.f32 %v3093_v56, %v3113_v12 }
0x17a7   :  { %v3106_v18 = vpop.xlane.xlu1 %3105  ;;  %v3109_v46 = vpop.xlane.xlu0 %3108 }
0x17a8   :  { %v3114_v63 = vmul.f32 0.03125, %v3106_v18  ;;  %v3115_v22 = vmul.f32 0.03125, %v3109_v46  ;;  %v3121_v23 = vmul.f32 %v3117_v59, %v3117_v59 }
0x17aa   :  { %v3118_v50 = vsub.f32 %v3094_v19, %v3114_v63  ;;  %v3119_v54 = vsub.f32 %v3095_v13, %v3115_v22  ;;  %v3125_v9 = vsel %vm119_vm0, %v3121_v23, 0.0 }
0x17ab   :  { %v3112_v52 = vpop.xlane.xlu1 %3111  ;;  %3126 = vadd.xlane.f32.xlu0 %v3125_v9 }
0x17ac   :  { %v3116_v5 = vmul.f32 0.03125, %v3112_v52  ;;  %v3122_v26 = vmul.f32 %v3118_v50, %v3118_v50  ;;  %v3123_v51 = vmul.f32 %v3119_v54, %v3119_v54 }
0x17ae   :  { %v3120_v27 = vsub.f32 %v3096_v53, %v3116_v5  ;;  %v3128_v60 = vsel %vm119_vm0, %v3122_v26, 0.0  ;;  %v3131_v28 = vsel %vm119_vm0, %v3123_v51, 0.0 }
0x17af   :  { %3129 = vadd.xlane.f32.xlu1 %v3128_v60  ;;  %3132 = vadd.xlane.f32.xlu0 %v3131_v28 }
0x17b0   :  { %v3124_v1 = vmul.f32 %v3120_v27, %v3120_v27 }
0x17b2   :  { %v3134_v29 = vsel %vm119_vm0, %v3124_v1, 0.0 }
0x17b3   :  { %3135 = vadd.xlane.f32.xlu1 %v3134_v29 }
0x17b4   :  { %3965 = shalt.err (!%p3962_p10)
}
0x17b5   :  { %s4019_s24 = smov 128   ;;  %s4020_s26 = smov 8   ;;  %v3334_v0 = vld [vmem:[%s4760_s14 + $0x1] ss:$0 sm:$0xff] }
0x17b6   :  { %3192 = dma.vmem_to_hbm [thread:$0]  %s3187_s22, 512, %s4762_s16, [#allocation4], %s4019_s24, %s4019_s24, %s4020_s26  }
0x17b7   :  { %v3335_v58 = vld [vmem:[%s4761_s15 + $0x1] ss:$0 sm:$0xff]  ;;  %s4021_s14 = smov [#allocation11]  }
0x17b8   :  { %s3198_s3 = sshll.u32 %s4021_s14, 4  ;;  %s3199_s3 = int_to_ptr.vmem [resolvable:$true] %s3198_s3 }
0x17b9   :  { %s3974_s15 = scalar_lea.vmem %s3199_s3, 512  ;;  %p3979_p12 = scmp.lt.s32.totalorder %s3199_s3, %s3199_s3 }
0x17ba   :  { %p3975_p11 = scmp.ne.s32.totalorder %s3199_s3, %s3974_s15  ;;  %p3980_p13 = scmp.lt.s32.totalorder %s3974_s15, %s3974_s15 }
0x17bc   :  { %p3981_p0 = por %p3980_p13, %p3979_p12 }
0x17be   :  { %p3982_p1 = pnand %p3981_p0, %p3975_p11 }
0x1834   :  { %v3127_v32 = vpop.xlane.xlu0 %3126 }
0x1835   :  { %v3137_v20 = vmul.f32 0.03125, %v3127_v32 }
0x1837   :  { %v3141_v33 = vadd.f32 1e-12, %v3137_v20 }
0x1838   :  { %v3130_v34 = vpop.xlane.xlu1 %3129  ;;  %v3133_v25 = vpop.xlane.xlu0 %3132 }
0x1839   :  { %3862 = vrsqrt.f32 %v3141_v33  ;;  %v3138_v35 = vmul.f32 0.03125, %v3130_v34  ;;  %v3139_v62 = vmul.f32 0.03125, %v3133_v25 }
0x183b   :  { %v3142_v36 = vadd.f32 1e-12, %v3138_v35  ;;  %v3143_v24 = vadd.f32 1e-12, %v3139_v62 }
0x183c   :  { %v3136_v39 = vpop.xlane.xlu1 %3135 }
0x183d   :  { %3864 = vrsqrt.f32 %v3142_v36  ;;  %v3140_v55 = vmul.f32 0.03125, %v3136_v39 }
0x183e   :  { %3866 = vrsqrt.f32 %v3143_v24 }
0x183f   :  { %v3144_v30 = vadd.f32 1e-12, %v3140_v55 }
0x1841   :  { %3868 = vrsqrt.f32 %v3144_v30 }
0x1846   :  { %v3863_v38 = vpop.eup %3862 }
0x1847   :  { %v3149_v6 = vmul.f32 %v3863_v38, %v3117_v59 }
0x1849   :  { %v3159_v4 = vmul.f32 %v3334_v0, %v3149_v6 }
0x184a   :  { %v3865_v57 = vpop.eup %3864 }
0x184b   :  { %v3867_v17 = vpop.eup %3866  ;;  %v3169_v61 = vadd.f32 %v3335_v58, %v3159_v4  ;;  %v3150_v40 = vmul.f32 %v3865_v57, %v3118_v50 }
0x184c   :  { %v3151_v7 = vmul.f32 %v3867_v17, %v3119_v54 }
0x184d   :  { %3177 = vst.msk [vmem:[#allocation11] sm:$0xff] %vm119_vm0, %v3169_v61  ;;  %v3160_v10 = vmul.f32 %v3334_v0, %v3150_v40 }
0x184e   :  { %v3869_v41 = vpop.eup %3868  ;;  %v3161_v37 = vmul.f32 %v3334_v0, %v3151_v7 }
0x184f   :  { %v3170_v42 = vadd.f32 %v3335_v58, %v3160_v10  ;;  %v3152_v43 = vmul.f32 %v3869_v41, %v3120_v27 }
0x1850   :  { %v3171_v44 = vadd.f32 %v3335_v58, %v3161_v37 }
0x1851   :  { %3178 = vst.msk [vmem:[#allocation11 + $0x8] sm:$0xff] %vm119_vm0, %v3170_v42  ;;  %v3162_v31 = vmul.f32 %v3334_v0, %v3152_v43 }
0x1852   :  { %3179 = vst.msk [vmem:[#allocation11 + $0x10] sm:$0xff] %vm119_vm0, %v3171_v44 }
0x1853   :  { %v3172_v45 = vadd.f32 %v3335_v58, %v3162_v31 }
0x1855   :  { %3180 = vst.msk [vmem:[#allocation11 + $0x18] sm:$0xff] %vm119_vm0, %v3172_v45 }
0x1856   :  { %3985 = shalt.err (!%p3982_p1)
}
0x1857   :  { %3204 = dma.vmem_to_hbm [thread:$0]  %s3199_s3, 512, %s4763_s17, [#allocation12], %s4019_s24, %s4019_s24, %s4020_s26  }
0x1858   :  { %4000 = dma.done.wait [#allocation4], 512  }
0x1859   :  { %4001 = vsyncadd [#allocation4], 4294966784 }
0x185a   :  { %4002 = dma.done.wait [#allocation12], 512  }
0x185b   :  { %4003 = vsyncadd [#allocation12], 4294966784 }
0x185c   :  { %3211 = vsyncpa [#allocation3], 1 }
0x185d   :  { %3212 = vsyncpa [#allocation6], 1 }
0x185e   :  { %3213 = vsyncpa [#allocation9], 1 }
0x185f   :  { %3214 = vsyncpa [#allocation4], 1 }
0x1860   :  { %3215 = vsyncpa [#allocation12], 1 }

</bundles_post_ra>
